<compile_context>
chip_gen: v5e
topology: v5e:2x2
jax: 0.10.0
libtpu: 0.0.40
codegen_flags: <defaults>
</compile_context>

<pallas_src>
import functools

import jax
import jax.numpy as jnp
from jax import lax
from jax.experimental import pallas as pl
from jax.experimental.pallas import tpu as pltpu


# ----------------------------- Pallas kernel -------------------------------- #
def _make_conv_bn_lrelu_kernel(K, stride, pad, H, W, Cin, TH, Wout, fold_taps):
    """One grid step: (re)build the zero-padded lane-dense image in a VMEM scratch
    (once per batch element), form the im2col slab for TH output rows, run ONE
    (TH*Wout, K*K*Cin) @ (K*K*Cin, ct) MXU dot, apply the folded-BN affine +
    LeakyReLU(0.1) in f32 and store one lane-dense bf16 (TH*Wout, ct) tile."""
    Hp = H + 2 * pad
    Wp = W + 2 * pad
    row_span = (TH - 1) * stride + K

    def kernel(x_ref, w_ref, sb_ref, o_ref, xpad_ref):
        # x_ref:    (H, W*Cin)     bf16  unpadded, lane-dense image of this batch elt
        # w_ref:    (K*K*Cin, ct)  bf16  conv weights, taps folded into the contraction
        # sb_ref:   (2, ct)        f32   row0 = BN scale, row1 = BN shift
        # o_ref:    (TH*Wout, ct)  bf16  lane-dense output tile
        # xpad_ref: (Hp, Wp*Cin)   bf16  persistent zero-padded image scratch
        c = pl.program_id(1)
        j = pl.program_id(2)

        # In-kernel spatial zero padding: rebuilt once per batch element (the x block
        # index only depends on the batch grid axis, so HBM is read exactly once per
        # image and a padded copy never round-trips through HBM).
        @pl.when((c == 0) & (j == 0))
        def _():
            xpad_ref[...] = jnp.zeros_like(xpad_ref)
            xpad_ref[pl.ds(pad, H), pl.ds(pad * Cin, W * Cin)] = x_ref[...]

        row0 = j * (TH * stride)
        if (TH * stride) % 8 == 0:
            row0 = pl.multiple_of(row0, 8)

        # Lane-dense window of the rows this step needs, unfolded once per step so the
        # K*K shifted taps are plain strided slices.
        xwin = xpad_ref[pl.ds(row0, row_span), :].reshape(row_span, Wp, Cin)

        def tap(kh, kw):
            patch = lax.slice(
                xwin,
                (kh, kw, 0),
                (kh + (TH - 1) * stride + 1, kw + (Wout - 1) * stride + 1, Cin),
                (stride, stride, 1),
            )                                        # (TH, Wout, Cin)
            return patch.reshape(TH * Wout, Cin)

        if fold_taps:
            # im2col slab built once per step -> a single deep-contraction MXU dot.
            slab = jnp.concatenate(
                [tap(kh, kw) for kh in range(K) for kw in range(K)], axis=-1)
            acc = jnp.dot(slab, w_ref[...], preferred_element_type=jnp.float32)
        else:
            # Large-Cin fallback: per-tap dots already have a full-lane contraction.
            acc = jnp.zeros((TH * Wout, o_ref.shape[-1]), jnp.float32)
            for kh in range(K):
                for kw in range(K):
                    q = (kh * K + kw) * Cin
                    acc += jnp.dot(tap(kh, kw), w_ref[pl.ds(q, Cin), :],
                                   preferred_element_type=jnp.float32)

        y = acc * sb_ref[0:1, :] + sb_ref[1:2, :]    # fused eval-mode BatchNorm affine
        y = jnp.where(y > 0, y, 0.1 * y)             # LeakyReLU(0.1)
        o_ref[...] = y.astype(o_ref.dtype)           # bf16 store; f32 stays on-chip

    return kernel


def _pick_row_tile(Hout, Wout, max_rows=2048):
    """Largest divisor TH of Hout whose (TH*Wout) output-row tile is sublane-aligned and
    stays within a VMEM-friendly row budget (2048, not 4096 -> v7x-safe output path)."""
    aligned = [th for th in range(1, Hout + 1)
               if Hout % th == 0 and (th * Wout) % 8 == 0 and th * Wout <= max_rows]
    if aligned:
        return max(aligned)
    # No aligned divisor fits: a full-extent block is always a legal block shape.
    # TODO(synk): pad W so Wout % 8 == 0 instead of this fallback, which can exceed the
    #             intended VMEM budget for very large feature maps.
    return Hout


def _vmem_limit_bytes(per_step_bytes):
    """Scoped-VMEM budget sized from the real block footprints, capped below the
    physical per-core capacity (~96 MiB usable on v5e/v6e, <=48 MiB on v7x)."""
    try:
        cap = int(pltpu.get_tpu_info().vmem_capacity_bytes)
    except Exception:
        cap = 64 << 20                       # assume the smallest (v7x per-core) VMEM
    want = max(2 * per_step_bytes, 32 << 20)
    return int(min(want, (cap * 3) // 4))


# ------------------------------ CNNBlock wrappers ---------------------------- #
def cnn_block_forward_nhwc(x_nhwc, params, *, stride, pad, keep_cout_pad=False):
    """x_nhwc: (N, H, W, Cin) -> (N, Hout, Wout, Cout[_pad]) bf16.  NHWC + bf16 output
    (and optionally the 128-padded Cout) so chained CNNBlocks avoid per-layer
    transposes, re-casts and channel-slice HBM passes."""
    w = params["conv_weight"]                          # (Cout, Cin, K, K) PyTorch OIHW
    gamma, beta = params["bn_gamma"], params["bn_beta"]
    rmean, rvar = params["bn_running_mean"], params["bn_running_var"]
    eps = 1e-5

    Cout, Cin, K, _ = w.shape
    N, H, W, _ = x_nhwc.shape
    Hout = (H + 2 * pad - K) // stride + 1
    Wout = (W + 2 * pad - K) // stride + 1
    Hp, Wp = H + 2 * pad, W + 2 * pad
    KKC = K * K * Cin

    # Fold eval-mode BN into a single packed (2, Cout_pad) f32 scale/shift array.
    scale = (gamma / jnp.sqrt(rvar + eps)).astype(jnp.float32)       # (Cout,)
    shift = (beta - rmean * scale).astype(jnp.float32)               # (Cout,)

    # Lane-dense output channels: pad Cout to a multiple of 128, tile by 128/256.
    Cout_pad = ((Cout + 127) // 128) * 128
    ct = 256 if Cout_pad % 256 == 0 else 128
    CT = Cout_pad // ct
    pad_c = Cout_pad - Cout
    sb = jnp.stack([jnp.pad(scale, (0, pad_c)), jnp.pad(shift, (0, pad_c))])

    # (Cout, Cin, K, K) -> (K*K*Cin, Cout_pad) bf16: the K*K taps become one deep MXU
    # contraction instead of K*K dots of depth Cin.
    w_k = jnp.transpose(w, (2, 3, 1, 0)).reshape(KKC, Cout)
    w_k = jnp.pad(w_k, ((0, 0), (0, pad_c))).astype(jnp.bfloat16)

    # Lane-dense activation: fold (W, Cin) into the minor axis.  No jnp.pad round trip
    # through HBM -- spatial zero padding happens in-kernel (VMEM scratch).
    x_fold = x_nhwc.astype(jnp.bfloat16).reshape(N, H, W * Cin)

    TH = _pick_row_tile(Hout, Wout)
    HT = Hout // TH
    fold_taps = KKC <= 2048        # keep the im2col slab comfortably inside VMEM

    kernel = _make_conv_bn_lrelu_kernel(K, stride, pad, H, W, Cin, TH, Wout, fold_taps)

    # Explicit scoped-VMEM budget from the actual block footprints.
    rup = lambda a, b: -(-a // b) * b
    per_step_bytes = (
        2 * rup(H, 8) * rup(W * Cin, 128) * 2            # input block (double-buffered)
        + rup(Hp, 8) * rup(Wp * Cin, 128) * 2            # persistent padded-image scratch
        + 2 * rup(KKC, 8) * ct * 2                       # weight block
        + 2 * 8 * ct * 4                                 # packed scale/shift block
        + 2 * rup(TH * Wout, 8) * ct * 2                 # bf16 output block
        + rup(TH * Wout, 8) * ct * 4                     # f32 accumulator value
        + rup(TH * Wout, 8) * rup(KKC, 128) * 2          # im2col slab value
    )

    out = pl.pallas_call(
        kernel,
        out_shape=jax.ShapeDtypeStruct((N, Hout * Wout, Cout_pad), jnp.bfloat16),
        # grid = (batch, Cout tiles, Hout-row tiles).  j innermost keeps the x / w /
        # scale-shift block indices constant across consecutive steps (no re-DMA).
        grid=(N, CT, HT),
        in_specs=[
            pl.BlockSpec((None, H, W * Cin), lambda n, c, j: (n, 0, 0)),
            pl.BlockSpec((KKC, ct),          lambda n, c, j: (0, c)),
            pl.BlockSpec((2, ct),            lambda n, c, j: (0, c)),
        ],
        out_specs=pl.BlockSpec((None, TH * Wout, ct), lambda n, c, j: (n, j, c)),
        scratch_shapes=[pltpu.VMEM((Hp, Wp * Cin), jnp.bfloat16)],
        compiler_params=pltpu.CompilerParams(
            # Shard only the batch axis across TensorCores (v7x): sharding c/j would put
            # a copy of the image in both cores' VMEM, and the per-batch scratch fill is
            # sequenced along the (arbitrary) c/j axes.
            dimension_semantics=("parallel", "arbitrary", "arbitrary"),
            vmem_limit_bytes=_vmem_limit_bytes(per_step_bytes),
        ),
    )(x_fold, w_k, sb)

    if keep_cout_pad:
        return out.reshape(N, Hout, Wout, Cout_pad)
    # TODO(synk): a masked final store of the real Cout would avoid this extra HBM pass
    #             for standalone use; chained blocks should pass keep_cout_pad=True.
    return out[:, :, :Cout].reshape(N, Hout, Wout, Cout)


def cnn_block_forward(x_nchw, params, *, stride, pad):
    """PyTorch-compatible NCHW/f32 wrapper around the NHWC/bf16 pipeline (the transpose
    and the f32 cast fuse into a single XLA pass)."""
    x = jnp.transpose(x_nchw, (0, 2, 3, 1))
    y = cnn_block_forward_nhwc(x, params, stride=stride, pad=pad)
    return jnp.transpose(y, (0, 3, 1, 2)).astype(jnp.float32)


# ------------------------------ reference (JAX) ------------------------------ #
def cnn_block_reference(x_nchw, params, *, stride, pad):
    w = params["conv_weight"]
    eps = 1e-5
    y = lax.conv_general_dilated(
        x_nchw, w,
        window_strides=(stride, stride),
        padding=((pad, pad), (pad, pad)),
        dimension_numbers=("NCHW", "OIHW", "NCHW"),
    )
    scale = params["bn_gamma"] / jnp.sqrt(params["bn_running_var"] + eps)
    shift = params["bn_beta"] - params["bn_running_mean"] * scale
    y = y * scale[None, :, None, None] + shift[None, :, None, None]
    return jnp.where(y > 0, y, 0.1 * y)


# ----------------------------------- main ------------------------------------ #
if __name__ == "__main__":
    # CNNBlock(in_channels=4, filters=8, kernel_size=3, stride=1, pad=1)
    in_channels, filters, kernel_size, stride, pad = 4, 8, 3, 1, 1
    N, H, W = 2, 16, 16

    key = jax.random.PRNGKey(0)
    kx, kw, kg, kb, km, kv = jax.random.split(key, 6)

    x = jax.random.normal(kx, (N, in_channels, H, W), dtype=jnp.float32)
    params = {
        "conv_weight": jax.random.normal(
            kw, (filters, in_channels, kernel_size, kernel_size), jnp.float32) * 0.1,
        "bn_gamma": jax.random.uniform(kg, (filters,), jnp.float32, 0.5, 1.5),
        "bn_beta": jax.random.normal(kb, (filters,), jnp.float32) * 0.1,
        "bn_running_mean": jax.random.normal(km, (filters,), jnp.float32) * 0.1,
        "bn_running_var": jax.random.uniform(kv, (filters,), jnp.float32, 0.5, 1.5),
    }

    fwd = jax.jit(functools.partial(cnn_block_forward, stride=stride, pad=pad))
    out = jax.block_until_ready(fwd(x, params))

    ref = jax.block_until_ready(cnn_block_reference(x, params, stride=stride, pad=pad))

    assert out.shape == (N, filters, H, W), out.shape
    # bf16 MXU operands + bf16 output store (f32 accumulation) vs. the f32 reference.
    max_err = float(jnp.max(jnp.abs(out - ref)))
    assert jnp.allclose(out, ref, atol=5e-2, rtol=5e-2), max_err

    print("KERNEL_OK")
</pallas_src>

<mosaic_0001>
module attributes {stable_mosaic.version = 11 : i64} {
  func.func @kernel(%arg0: i32, %arg1: i32, %arg2: i32, %arg3: memref<1x16x64xbf16, #tpu.memory_space<vmem>>, %arg4: memref<36x128xbf16, #tpu.memory_space<vmem>>, %arg5: memref<2x128xf32, #tpu.memory_space<vmem>>, %arg6: memref<1x256x128xbf16, #tpu.memory_space<vmem>>, %arg7: memref<18x72xbf16, #tpu.memory_space<vmem>>) attributes {dimension_semantics = [#tpu.dimension_semantics<parallel>, #tpu.dimension_semantics<arbitrary>, #tpu.dimension_semantics<arbitrary>], iteration_bounds = array<i64: 2, 1, 1>, scalar_prefetch = 0 : i64, scratch_operands = 1 : i64, tpu.core_type = #tpu.core_type<tc>, window_params = [{transform_indices = @transform_0, window_bounds = array<i64: 1, 16, 64>}, {transform_indices = @transform_1, window_bounds = array<i64: 36, 128>}, {transform_indices = @transform_2, window_bounds = array<i64: 2, 128>}, {transform_indices = @transform_3, window_bounds = array<i64: 1, 256, 128>}]} {
    %c0_i32 = arith.constant 0 : i32
    %0 = arith.cmpi eq, %arg1, %c0_i32 : i32
    %c0_i32_0 = arith.constant 0 : i32
    %1 = arith.cmpi eq, %arg2, %c0_i32_0 : i32
    %2 = arith.andi %0, %1 : i1
    %3 = arith.extui %2 : i1 to i32
    %c0_i32_1 = arith.constant 0 : i32
    %4 = arith.cmpi ne, %3, %c0_i32_1 : i32
    scf.if %4 {
      %cst_12 = arith.constant 0.000000e+00 : bf16
      %46 = vector.broadcast %cst_12 : bf16 to vector<18x72xbf16>
      %c0_13 = arith.constant 0 : index
      %c0_14 = arith.constant 0 : index
      %47 = vector.load %arg7[%c0_13, %c0_14] : memref<18x72xbf16, #tpu.memory_space<vmem>>, vector<18x72xbf16>
      tpu.vector_store %arg7[%c0_13, %c0_14], %46 {strides = array<i32>} : memref<18x72xbf16, #tpu.memory_space<vmem>>, vector<18x72xbf16>,
      %c0_15 = arith.constant 0 : index
      %c0_16 = arith.constant 0 : index
      %c0_17 = arith.constant 0 : index
      %48 = vector.load %arg3[%c0_15, %c0_16, %c0_17] : memref<1x16x64xbf16, #tpu.memory_space<vmem>>, vector<1x16x64xbf16>
      %49 = vector.shape_cast %48 : vector<1x16x64xbf16> to vector<16x64xbf16>
      %c1_18 = arith.constant 1 : index
      %c4 = arith.constant 4 : index
      %50 = vector.load %arg7[%c1_18, %c4] : memref<18x72xbf16, #tpu.memory_space<vmem>>, vector<16x64xbf16>
      tpu.vector_store %arg7[%c1_18, %c4], %49 {strides = array<i32>} : memref<18x72xbf16, #tpu.memory_space<vmem>>, vector<16x64xbf16>,
    } else {
    }
    %c16_i32 = arith.constant 16 : i32
    %5 = arith.muli %arg2, %c16_i32 : i32
    %6 = tpu.assume_multiple %5, 8 : i32
    %7 = arith.index_cast %6 : i32 to index
    %c0 = arith.constant 0 : index
    %8 = vector.load %arg7[%7, %c0] : memref<18x72xbf16, #tpu.memory_space<vmem>>, vector<18x72xbf16>
    %9 = vector.shape_cast %8 : vector<18x72xbf16> to vector<18x18x4xbf16>
    %10 = vector.extract_strided_slice %9 {offsets = [0, 0, 0], sizes = [16, 16, 4], strides = [1, 1, 1]} : vector<18x18x4xbf16> to vector<16x16x4xbf16>
    %11 = vector.shape_cast %10 : vector<16x16x4xbf16> to vector<256x4xbf16>
    %12 = vector.extract_strided_slice %9 {offsets = [0, 1, 0], sizes = [16, 16, 4], strides = [1, 1, 1]} : vector<18x18x4xbf16> to vector<16x16x4xbf16>
    %13 = vector.shape_cast %12 : vector<16x16x4xbf16> to vector<256x4xbf16>
    %14 = vector.extract_strided_slice %9 {offsets = [0, 2, 0], sizes = [16, 16, 4], strides = [1, 1, 1]} : vector<18x18x4xbf16> to vector<16x16x4xbf16>
    %15 = vector.shape_cast %14 : vector<16x16x4xbf16> to vector<256x4xbf16>
    %16 = vector.extract_strided_slice %9 {offsets = [1, 0, 0], sizes = [16, 16, 4], strides = [1, 1, 1]} : vector<18x18x4xbf16> to vector<16x16x4xbf16>
    %17 = vector.shape_cast %16 : vector<16x16x4xbf16> to vector<256x4xbf16>
    %18 = vector.extract_strided_slice %9 {offsets = [1, 1, 0], sizes = [16, 16, 4], strides = [1, 1, 1]} : vector<18x18x4xbf16> to vector<16x16x4xbf16>
    %19 = vector.shape_cast %18 : vector<16x16x4xbf16> to vector<256x4xbf16>
    %20 = vector.extract_strided_slice %9 {offsets = [1, 2, 0], sizes = [16, 16, 4], strides = [1, 1, 1]} : vector<18x18x4xbf16> to vector<16x16x4xbf16>
    %21 = vector.shape_cast %20 : vector<16x16x4xbf16> to vector<256x4xbf16>
    %22 = vector.extract_strided_slice %9 {offsets = [2, 0, 0], sizes = [16, 16, 4], strides = [1, 1, 1]} : vector<18x18x4xbf16> to vector<16x16x4xbf16>
    %23 = vector.shape_cast %22 : vector<16x16x4xbf16> to vector<256x4xbf16>
    %24 = vector.extract_strided_slice %9 {offsets = [2, 1, 0], sizes = [16, 16, 4], strides = [1, 1, 1]} : vector<18x18x4xbf16> to vector<16x16x4xbf16>
    %25 = vector.shape_cast %24 : vector<16x16x4xbf16> to vector<256x4xbf16>
    %26 = vector.extract_strided_slice %9 {offsets = [2, 2, 0], sizes = [16, 16, 4], strides = [1, 1, 1]} : vector<18x18x4xbf16> to vector<16x16x4xbf16>
    %27 = vector.shape_cast %26 : vector<16x16x4xbf16> to vector<256x4xbf16>
    %28 = tpu.concatenate %11, %13, %15, %17, %19, %21, %23, %25, %27 in 1 : vector<256x4xbf16>, vector<256x4xbf16>, vector<256x4xbf16>, vector<256x4xbf16>, vector<256x4xbf16>, vector<256x4xbf16>, vector<256x4xbf16>, vector<256x4xbf16>, vector<256x4xbf16> -> vector<256x36xbf16>
    %c0_2 = arith.constant 0 : index
    %c0_3 = arith.constant 0 : index
    %29 = vector.load %arg4[%c0_2, %c0_3] : memref<36x128xbf16, #tpu.memory_space<vmem>>, vector<36x128xbf16>
    %cst = arith.constant dense<0.000000e+00> : vector<256x128xf32>
    %30 = tpu.matmul %28, %29, %cst {dimension_numbers = #tpu.dot_dimension_numbers<[1], [0], [0], [1], [0, 0, 1, 1], [], []>} : vector<256x36xbf16>, vector<36x128xbf16>, vector<256x128xf32> -> vector<256x128xf32>
    %c0_4 = arith.constant 0 : index
    %c0_5 = arith.constant 0 : index
    %31 = vector.load %arg5[%c0_4, %c0_5] : memref<2x128xf32, #tpu.memory_space<vmem>>, vector<1x128xf32>
    %32 = vector.broadcast %31 : vector<1x128xf32> to vector<256x128xf32>
    %33 = arith.mulf %30, %32 : vector<256x128xf32>
    %c1 = arith.constant 1 : index
    %c0_6 = arith.constant 0 : index
    %34 = vector.load %arg5[%c1, %c0_6] : memref<2x128xf32, #tpu.memory_space<vmem>>, vector<1x128xf32>
    %35 = vector.broadcast %34 : vector<1x128xf32> to vector<256x128xf32>
    %36 = arith.addf %33, %35 : vector<256x128xf32>
    %cst_7 = arith.constant 0.000000e+00 : f32
    %37 = vector.broadcast %cst_7 : f32 to vector<256x128xf32>
    %38 = arith.cmpf ogt, %36, %37 : vector<256x128xf32>
    %cst_8 = arith.constant 1.000000e-01 : f32
    %39 = vector.broadcast %cst_8 : f32 to vector<256x128xf32>
    %40 = arith.mulf %39, %36 : vector<256x128xf32>
    %41 = arith.select %38, %36, %40 : vector<256x128xi1>, vector<256x128xf32>
    %42 = arith.truncf %41 : vector<256x128xf32> to vector<256x128xbf16>
    %c0_9 = arith.constant 0 : index
    %c0_10 = arith.constant 0 : index
    %c0_11 = arith.constant 0 : index
    %43 = vector.load %arg6[%c0_9, %c0_10, %c0_11] : memref<1x256x128xbf16, #tpu.memory_space<vmem>>, vector<1x256x128xbf16>
    %44 = vector.shape_cast %43 : vector<1x256x128xbf16> to vector<256x128xbf16>
    %45 = vector.shape_cast %42 : vector<256x128xbf16> to vector<1x256x128xbf16>
    tpu.vector_store %arg6[%c0_9, %c0_10, %c0_11], %45 {strides = array<i32>} : memref<1x256x128xbf16, #tpu.memory_space<vmem>>, vector<1x256x128xbf16>,
    return
  }
  func.func @transform_0(%arg0: i32, %arg1: i32, %arg2: i32) -> (i32, i32, i32) {
    %c0_i32 = arith.constant 0 : i32
    %c0_i32_0 = arith.constant 0 : i32
    %c0_i32_1 = arith.constant 0 : i32
    return %arg0, %c0_i32, %c0_i32_0 : i32, i32, i32
  }
  func.func @transform_1(%arg0: i32, %arg1: i32, %arg2: i32) -> (i32, i32) {
    %c0_i32 = arith.constant 0 : i32
    %c0_i32_0 = arith.constant 0 : i32
    return %c0_i32, %arg1 : i32, i32
  }
  func.func @transform_2(%arg0: i32, %arg1: i32, %arg2: i32) -> (i32, i32) {
    %c0_i32 = arith.constant 0 : i32
    %c0_i32_0 = arith.constant 0 : i32
    return %c0_i32, %arg1 : i32, i32
  }
  func.func @transform_3(%arg0: i32, %arg1: i32, %arg2: i32) -> (i32, i32, i32) {
    %c0_i32 = arith.constant 0 : i32
    return %arg0, %arg2, %arg1 : i32, i32, i32
  }
}

</mosaic_0001>

<bundles_post_ra>
// kernel: cnn_block_forward.1
= control target key start
LH: loop header
LB: loop body
LE: loop exit
PB: predicated region body
PF: predicated region fallthrough
CT: control target
= control target key end

     0   :  { %s3043_s12 = smov 0   ;;  %s3045_s13 = smov 0   ;;  %s4883_s0 = inlined_call_operand.vmem [shape: bf16[2,16,64], index: 0, kind: input, shape index: {}]   ;;  %s4884_s1 = inlined_call_operand.vmem [shape: bf16[36,128], index: 1, kind: input, shape index: {}]   ;;  %s4885_s2 = inlined_call_operand.vmem [shape: f32[2,128], index: 2, kind: input, shape index: {}]   ;;  %s4886_s3 = inlined_call_operand.vmem [shape: bf16[2,256,128], index: 3, kind: output, shape index: {}]  }
   0x1   :  { %s3047_s14 = smov 0  }
   0x2 LB: > { %s32_s15 = sadd.s32 1, %s2989_s13  ;;  %p2760_p0 = scmp.ge.s32.totalorder %s2993_s14, 1  ;;  %s2993_s14 = sphi %s3047_s14, %s13_s14   ;;  %s2989_s13 = sphi %s3045_s13, %s5156_s13   ;;  %s2985_s12 = sphi %s3043_s12, %s5155_s12  }
   0x3   : > { %p34_p1 = scmp.ge.s32.totalorder %s32_s15, 2  ;;  %p178_p2 = scmp.lt.s32.totalorder %s2993_s14, 3 }
   0x5   : > { %s5158_s15 = smov (%p34_p1, %s32_s15), 0  ;;  %p179_p3 = pnand %p2760_p0, %p178_p2 }
   0x7   : > { %182 = sbr.rel (%p179_p3) target bundleno = 1002 (0x3ea), region = 32 }
   0xc   : > { %p217_p4 = scmp.lt.s32.totalorder %s2985_s12, 1  ;;  %vm250_vm0 = vcmask 584704   ;;  %v2995_v0 = vmov 0   ;;  %vm257_vm1 = vsmask.f32 256  ;;  %s2996_s20 = smov 4  }
   0xd   : > { %251 = vst.msk [vmem:[#allocation2] sm:$0xf] %vm250_vm0, %v2995_v0  ;;  %vm258_vm2 = vsmask.f32 4368  ;;  %vm253_vm4 = vcmask 581632   ;;  %vm286_vm5 = vcmask 551968  }
   0xe   : > { %s5160_s12 = smov (!%p217_p4, %s2985_s12), 1  ;;  %252 = vst.msk [vmem:[#allocation2 + $0x4] sm:$0xf] %vm250_vm0, %v2995_v0  ;;  %vm259_vm3 = vmor %vm257_vm1, %vm258_vm2  ;;  %vm287_vm6 = vsmask.f32 7938  ;;  %vm294_vm7 = vcmask 548896  }
   0xf   : > { %s2809_s16 = sshll.u32 %s5160_s12, 3  ;;  %254 = vst.msk [vmem:[#allocation2 + $0x8] sm:$0x1] %vm253_vm4, %v2995_v0  ;;  %vm288_vm8 = vmand %vm286_vm5, %vm287_vm6  ;;  %s2997_s21 = smov 120   ;;  %v3014_v38 = vmov 1983009808  }
  0x10   : > { %s221_s19 = scalar_lea.vmem %s4883_s0, %s2809_s16  ;;  %vm295_vm9 = vmand %vm294_vm7, %vm257_vm1  ;;  %s2998_s22 = smov 124   ;;  %v461_v39 = vunpack.c.l.s4 %v3014_v38  ;;  %vm458_vm10 = vcmask 1047556   ;;  %v3015_v50 = vmov 1934713408   ;;  %vm1379_vm11 = vcmask 1042432  }
  0x11   : > { %v255_v1 = vld [vmem:[%s221_s19] sm:$0xf]  ;;  %v256_v2 = vld [vmem:[%s221_s19 + $0x4] sm:$0xf]  ;;  %s2999_s23 = smov 116   ;;  %s3000_s24 = smov 112   ;;  %v475_v51 = vunpack.c.l.s4 %v3015_v50 }
  0x12   : > { %v261_v3 = vshrl.u32 %v255_v1, 16  ;;  %v264_v4 = vshll.u32 %v255_v1, 16  ;;  %v269_v5 = vshrl.u32 %v256_v2, 16  ;;  %v272_v8 = vshll.u32 %v256_v2, 16  ;;  %s3001_s25 = smov 108   ;;  %s3002_s26 = smov 104  }
  0x13   : > { %s3003_s27 = smov 100   ;;  %s3004_s28 = smov 96   ;;  %v3141_v44 = vunpack.c.0.s8 %v461_v39  ;;  %v3149_v59 = vunpack.c.0.s8 %v475_v51  ;;  %vm1380_vm12 = vcmask 1046532   ;;  %vm992_vm13 = vsmask.f32 3328 }
  0x14   : > { %v263_v6 = vrot.slane %v261_v3, 7  ;;  %v271_v7 = vrot.slane %v269_v5, 7  ;;  %v289_v14 = vld [vmem:[#allocation2] sm:$0xf]  ;;  %s3005_s29 = smov 92   ;;  %s3006_s30 = smov 88   ;;  %vm3448_vm15 = vmor %vm1379_vm11, %vm1380_vm12 }
  0x15   : > { %s3007_s4 = smov 84   ;;  %s3008_s5 = smov 80   ;;  %vm993_vm14 = vsmask.f32 7440  ;;  %vm1974_vm1 = vcmask 31744   ;;  %vm2023_vm2 = vcmask 64512  }
  0x16   : > { %v266_v9 = vor.u32 %v264_v4, %v263_v6  ;;  %v276_v10 = vrot.slane %v271_v7, 4  ;;  %v267_v11 = vrot.slane %v263_v6, 4  ;;  %v274_v12 = vor.u32 %v272_v8, %v271_v7  ;;  %v296_v15 = vld [vmem:[#allocation2 + $0x8] sm:$0x1]  ;;  %s3009_s6 = smov 76   ;;  %s3010_s7 = smov 72   ;;  %vm3470_vm0 = vmor %vm992_vm13, %vm993_vm14 }
  0x17   : > { %s3011_s8 = smov 68   ;;  %s3012_s9 = smov 64   ;;  %vm2056_vm4 = vcmask 97280   ;;  %vm2122_vm6 = vcmask 162816   ;;  %vm2155_vm7 = vcmask 195584  }
  0x18   : > { %277 = vrot.lane.b32.xlu0 %v266_v9, %s2996_s20  ;;  %281 = vrot.lane.b32.xlu1 %v276_v10, %s2996_s20  ;;  %v275_v13 = vsel %vm259_vm3, %v267_v11, %v274_v12  ;;  %s3013_s10 = smov 60   ;;  %s3016_s11 = smov 12   ;;  %vm2307_vm3 = vcmask 1041408  }
  0x19   : > { %s3017_s16 = smov 24   ;;  %s3018_s17 = smov 8  }
  0x1a   : > { %s3019_s18 = smov 20   ;;  %s3020_s19 = smov 16  }
  0x20   : > { %279 = vrot.lane.b32.xlu0 %v275_v13, %s2996_s20 }
  0x8a   : > { %v278_v16 = vpop.permute.xlu0 %277  ;;  %v282_v17 = vpop.permute.xlu1 %281 }
  0x8b   : > { %v290_v18 = vsel %vm288_vm8, %v278_v16, %v289_v14  ;;  %v297_v19 = vsel %vm295_vm9, %v282_v17, %v296_v15  ;;  %vm2221_vm8 = vcmask 261120   ;;  %vm2188_vm9 = vcmask 228352  }
  0x8c   : > { %291 = vst [vmem:[#allocation2] sm:$0xf] %v290_v18 }
  0x8d   : > { %298 = vst [vmem:[#allocation2 + $0x8] sm:$0x1] %v297_v19 }
  0x92   : > { %v280_v20 = vpop.permute.xlu0 %279 }
  0x93   : > { %v3072_v21 = vld [vmem:[#allocation2] sm:$0xf]  ;;  %293 = vst.msk [vmem:[#allocation2 + $0x4] sm:$0xf] %vm286_vm5, %v280_v20  ;;  %vm2089_vm5 = vcmask 130048  }
  0x94   : > { %319 = vrot.lane.b32.xlu0 %v3072_v21, %s2997_s21  ;;  %310 = vrot.lane.b32.xlu1 %v3072_v21, %s2998_s22  ;;  %v3081_v23 = vld [vmem:[#allocation2 + $0x8] sm:$0x1] }
  0x9a   : > { %v3076_v22 = vld [vmem:[#allocation2 + $0x4] sm:$0xf] }
  0x9b   : > { %312 = vrot.lane.b32.xlu2 %v3076_v22, %s2998_s22 }
  0x9c   : > { %328 = vrot.lane.b32.xlu0 %v3072_v21, %s2999_s23  ;;  %321 = vrot.lane.b32.xlu1 %v3076_v22, %s2997_s21 }
  0xa3   : > { %314 = vrot.lane.b32.xlu2 %v3081_v23, %s2998_s22  ;;  %s3022_s22 = smov 28  }
  0xa4   : > { %337 = vrot.lane.b32.xlu0 %v3072_v21, %s3000_s24  ;;  %330 = vrot.lane.b32.xlu1 %v3076_v22, %s2999_s23 }
  0xab   : > { %323 = vrot.lane.b32.xlu2 %v3081_v23, %s2997_s21  ;;  %s3021_s21 = smov 32  }
  0xac   : > { %346 = vrot.lane.b32.xlu0 %v3072_v21, %s3001_s25  ;;  %339 = vrot.lane.b32.xlu1 %v3076_v22, %s3000_s24 }
  0xb3   : > { %332 = vrot.lane.b32.xlu2 %v3081_v23, %s2999_s23 }
  0xb4   : > { %355 = vrot.lane.b32.xlu0 %v3072_v21, %s3002_s26  ;;  %348 = vrot.lane.b32.xlu1 %v3076_v22, %s3001_s25 }
  0xbb   : > { %341 = vrot.lane.b32.xlu2 %v3081_v23, %s3000_s24 }
  0xbc   : > { %364 = vrot.lane.b32.xlu0 %v3072_v21, %s3003_s27  ;;  %357 = vrot.lane.b32.xlu1 %v3076_v22, %s3002_s26 }
  0xc3   : > { %350 = vrot.lane.b32.xlu2 %v3081_v23, %s3001_s25 }
  0xc4   : > { %373 = vrot.lane.b32.xlu0 %v3072_v21, %s3004_s28  ;;  %366 = vrot.lane.b32.xlu1 %v3076_v22, %s3003_s27 }
  0xcb   : > { %359 = vrot.lane.b32.xlu2 %v3081_v23, %s3002_s26 }
  0xcc   : > { %382 = vrot.lane.b32.xlu0 %v3072_v21, %s3005_s29  ;;  %375 = vrot.lane.b32.xlu1 %v3076_v22, %s3004_s28 }
  0xd3   : > { %368 = vrot.lane.b32.xlu2 %v3081_v23, %s3003_s27 }
  0xd4   : > { %391 = vrot.lane.b32.xlu0 %v3072_v21, %s3006_s30  ;;  %384 = vrot.lane.b32.xlu1 %v3076_v22, %s3005_s29 }
  0xdb   : > { %377 = vrot.lane.b32.xlu2 %v3081_v23, %s3004_s28 }
  0xdc   : > { %400 = vrot.lane.b32.xlu0 %v3072_v21, %s3007_s4  ;;  %393 = vrot.lane.b32.xlu1 %v3076_v22, %s3006_s30 }
  0xe3   : > { %386 = vrot.lane.b32.xlu2 %v3081_v23, %s3005_s29 }
  0xe4   : > { %409 = vrot.lane.b32.xlu0 %v3072_v21, %s3008_s5  ;;  %402 = vrot.lane.b32.xlu1 %v3076_v22, %s3007_s4 }
  0xeb   : > { %395 = vrot.lane.b32.xlu2 %v3081_v23, %s3006_s30 }
  0xec   : > { %418 = vrot.lane.b32.xlu0 %v3072_v21, %s3009_s6  ;;  %411 = vrot.lane.b32.xlu1 %v3076_v22, %s3008_s5 }
  0xf3   : > { %404 = vrot.lane.b32.xlu2 %v3081_v23, %s3007_s4 }
  0xf4   : > { %427 = vrot.lane.b32.xlu0 %v3072_v21, %s3010_s7  ;;  %420 = vrot.lane.b32.xlu1 %v3076_v22, %s3009_s6 }
  0xf5   : > { %v3116_v24 = vpop.permute.xlu2 %312 }
  0xfb   : > { %413 = vrot.lane.b32.xlu2 %v3081_v23, %s3008_s5  ;;  %s2810_s5 = sshll.u32 %s5160_s12, 7 }
  0xfc   : > { %436 = vrot.lane.b32.xlu0 %v3072_v21, %s3011_s8  ;;  %429 = vrot.lane.b32.xlu1 %v3076_v22, %s3010_s7 }
  0xfd   : > { %v315_v25 = vpop.permute.xlu2 %314 }
 0x103   : > { %422 = vrot.lane.b32.xlu2 %v3081_v23, %s3009_s6 }
 0x104   : > { %445 = vrot.lane.b32.xlu0 %v3072_v21, %s3012_s9  ;;  %438 = vrot.lane.b32.xlu1 %v3076_v22, %s3011_s8 }
 0x105   : > { %v324_v26 = vpop.permute.xlu2 %323 }
 0x106   : > { %v3124_v27 = vpop.permute.xlu1 %310  ;;  %v3126_v28 = vpop.permute.xlu0 %319 }
 0x10b   : > { %431 = vrot.lane.b32.xlu2 %v3081_v23, %s3010_s7 }
 0x10c   : > { %451 = vrot.lane.b32.xlu0 %v3072_v21, %s3013_s10  ;;  %447 = vrot.lane.b32.xlu1 %v3076_v22, %s3012_s9 }
 0x10d   : > { %v333_v29 = vpop.permute.xlu2 %332 }
 0x10e   : > { %v3131_v30 = vpop.permute.xlu1 %321  ;;  %v329_v31 = vpop.permute.xlu0 %328 }
 0x113   : > { %440 = vrot.lane.b32.xlu2 %v3081_v23, %s3011_s8  ;;  %s4762_s8 = scalar_lea.vmem %s4886_s3, %s2810_s5 }
 0x114   : > { %453 = vrot.lane.b32.xlu1 %v3076_v22, %s3013_s10 }
 0x115   : > { %v342_v32 = vpop.permute.xlu2 %341 }
 0x116   : > { %v3135_v33 = vpop.permute.xlu1 %330  ;;  %v338_v34 = vpop.permute.xlu0 %337  ;;  %v758_v45 = vrot.slane %v342_v32, 4 }
 0x117   : > { %v457_v15 = vrot.slane %v338_v34, 4 }
 0x118   : > { %v759_v48 = vsel %vm458_vm10, %v758_v45, %v3081_v23 }
 0x119   : > { %v763_v57 = vperm.slane %v759_v48, %v3141_v44  ;;  %v459_v20 = vsel %vm458_vm10, %v457_v15, %v3072_v21 }
 0x11b   : > { %449 = vrot.lane.b32.xlu2 %v3081_v23, %s3012_s9 }
 0x11d   : > { %v351_v35 = vpop.permute.xlu2 %350 }
 0x11e   : > { %v3138_v36 = vpop.permute.xlu1 %339  ;;  %v347_v37 = vpop.permute.xlu0 %346  ;;  %v776_v49 = vrot.slane %v351_v35, 4 }
 0x11f   : > { %v486_v16 = vrot.slane %v347_v37, 4  ;;  %v608_v21 = vrot.slane %v3138_v36, 4 }
 0x120   : > { %v777_v58 = vsel %vm458_vm10, %v776_v49, %v315_v25 }
 0x121   : > { %v781_v63 = vperm.slane %v777_v58, %v3141_v44 }
 0x123   : > { %455 = vrot.lane.b32.xlu2 %v3081_v23, %s3013_s10  ;;  %v487_v23 = vsel %vm458_vm10, %v486_v16, %v3124_v27 }
 0x124   : > { %v491_v37 = vperm.slane %v487_v23, %v3141_v44 }
 0x125   : > { %v360_v40 = vpop.permute.xlu2 %359 }
 0x126   : > { %v764_v41 = vrot.slane %v360_v40, 4  ;;  %v349_v42 = vpop.permute.xlu1 %348  ;;  %v356_v43 = vpop.permute.xlu0 %355 }
 0x127   : > { %v464_v13 = vrot.slane %v356_v43, 4  ;;  %v636_v32 = vrot.slane %v349_v42, 4  ;;  %v500_v43 = vrot.slane %v491_v37, 4 }
 0x128   : > { %v765_v46 = vsel %vm458_vm10, %v764_v41, %v324_v26 }
 0x129   : > { %v769_v47 = vperm.slane %v765_v46, %v3141_v44  ;;  %v465_v17 = vsel %vm458_vm10, %v464_v13, %v3126_v28  ;;  %v637_v38 = vsel %vm458_vm10, %v636_v32, %v3116_v24  ;;  %v609_v46 = vsel %vm458_vm10, %v608_v21, %v3076_v22 }
 0x12a   : > { %v469_v34 = vperm.slane %v465_v17, %v3141_v44  ;;  %v641_v24 = vperm.slane %v637_v38, %v3141_v44  ;;  %v613_v22 = vperm.slane %v609_v46, %v3141_v44 }
 0x12b   : > { %v770_v52 = vrot.slane %v769_v47, 4 }
 0x12c   : > { %v470_v39 = vrot.slane %v469_v34, 4 }
 0x12d   : > { %v369_v53 = vpop.permute.xlu2 %368  ;;  %v771_v61 = vsel %vm458_vm10, %v770_v52, %v763_v57 }
 0x12e   : > { %v782_v54 = vrot.slane %v369_v53, 4  ;;  %v358_v55 = vpop.permute.xlu1 %357  ;;  %v365_v56 = vpop.permute.xlu0 %364  ;;  %v3156_v1 = vperm.slane %v771_v61, %v3149_v59 }
 0x12f   : > { %v492_v14 = vrot.slane %v365_v56, 4  ;;  %v614_v35 = vrot.slane %v358_v55, 4  ;;  %v650_v55 = vrot.slane %v641_v24, 4 }
 0x130   : > { %v783_v60 = vsel %vm458_vm10, %v782_v54, %v333_v29  ;;  %v881_v7 = vshrl.u32 %v3156_v1, 16 }
 0x131   : > { %v787_v62 = vperm.slane %v783_v60, %v3141_v44  ;;  %v493_v18 = vsel %vm458_vm10, %v492_v14, %v329_v31  ;;  %v463_v31 = vperm.slane %v459_v20, %v3141_v44  ;;  %v615_v40 = vsel %vm458_vm10, %v614_v35, %v3131_v30 }
 0x132   : > { %v497_v28 = vperm.slane %v493_v18, %v3141_v44  ;;  %v619_v30 = vperm.slane %v615_v40, %v3141_v44  ;;  %v622_v60 = vrot.slane %v613_v22, 4 }
 0x133   : > { %v788_v0 = vrot.slane %v787_v62, 4  ;;  %v472_v42 = vrot.slane %v463_v31, 4  ;;  %v471_v50 = vsel %vm458_vm10, %v470_v39, %v463_v31 }
 0x134   : > { %v498_v41 = vrot.slane %v497_v28, 4  ;;  %v501_v49 = vsel %vm458_vm10, %v497_v28, %v500_v43  ;;  %v477_v56 = vperm.slane %v471_v50, %v3149_v59  ;;  %v620_v57 = vrot.slane %v619_v30, 4 }
 0x135   : > { %v789_v2 = vsel %vm458_vm10, %v788_v0, %v781_v63  ;;  %v3159_v3 = vpop.permute.xlu2 %377  ;;  %v473_v48 = vsel %vm458_vm10, %v469_v34, %v472_v42  ;;  %v509_v53 = vperm.slane %v501_v49, %v3149_v59  ;;  %v623_v13 = vsel %vm458_vm10, %v619_v30, %v622_v60 }
 0x136   : > { %v3162_v4 = vperm.slane %v789_v2, %v3149_v59  ;;  %v367_v5 = vpop.permute.xlu1 %366  ;;  %v3164_v6 = vpop.permute.xlu0 %373  ;;  %v499_v51 = vsel %vm458_vm10, %v498_v41, %v491_v37  ;;  %v481_v52 = vperm.slane %v473_v48, %v3149_v59  ;;  %v482_v14 = vrot.slane %v477_v56, 4 }
 0x137   : > { %v642_v29 = vrot.slane %v367_v5, 4  ;;  %v505_v58 = vperm.slane %v499_v51, %v3149_v59  ;;  %v846_v20 = vshrl.u32 %v509_v53, 16  ;;  %v631_v34 = vperm.slane %v623_v13, %v3149_v59 }
 0x138   : > { %v882_v8 = vshrl.u32 %v3162_v4, 16  ;;  %v484_v5 = vrot.slane %v481_v52, 4  ;;  %v3231_v17 = vpack.i.b16 %v509_v53, %v481_v52  ;;  %v833_v35 = vshrl.u32 %v477_v56, 16 }
 0x139   : > { %v643_v27 = vsel %vm458_vm10, %v642_v29, %v3135_v33  ;;  %v510_v15 = vrot.slane %v505_v58, 4  ;;  %v834_v18 = vshrl.u32 %v505_v58, 16  ;;  %v845_v29 = vshrl.u32 %v481_v52, 16 }
 0x13a   : > { %v3168_v9 = vpack.i.b16 %v882_v8, %v881_v7  ;;  %v647_v36 = vperm.slane %v643_v27, %v3141_v44  ;;  %v512_v7 = vrot.slane %v509_v53, 4  ;;  %v621_v8 = vsel %vm458_vm10, %v620_v57, %v613_v22 }
 0x13b   : > { %v627_v32 = vperm.slane %v621_v8, %v3149_v59  ;;  %v3241_v31 = vpack.i.b16 %v3162_v4, %v3156_v1  ;;  %v485_v37 = vsel %vm458_vm10, 0, %v484_v5  ;;  %v483_v21 = vsel %vm458_vm10, 0, %v482_v14 }
 0x13c   : > { %4967 = vst [vmem:[#allocation3_spill] sm:$0xff] %v3168_v9  ;;  %v648_v54 = vrot.slane %v647_v36, 4  ;;  %v651_v61 = vsel %vm458_vm10, %v647_v36, %v650_v55  ;;  %v3237_v28 = vsel %vm458_vm10, 0, %v512_v7  ;;  %v511_v27 = vsel %vm458_vm10, 0, %v510_v15 }
 0x13d   : > { %v3170_v10 = vpop.permute.xlu2 %386  ;;  %v659_v16 = vperm.slane %v651_v61, %v3149_v59  ;;  %4968 = vst [vmem:[#allocation4_spill] sm:$0xff] %v3241_v31  ;;  %v1564_v38 = vunpack.c.l.b16 %v3231_v17  ;;  %v3247_v39 = vpack.i.b16 %v834_v18, %v833_v35  ;;  %v3249_v40 = vpack.i.b16 %v846_v20, %v845_v29 }
 0x13e   : > { %v3172_v11 = vpop.permute.xlu1 %375  ;;  %v3174_v12 = vpop.permute.xlu0 %382  ;;  %v649_v63 = vsel %vm458_vm10, %v648_v54, %v641_v24  ;;  %v3254_v46 = vpack.i.b16 %v3237_v28, %v485_v37  ;;  %v857_v48 = vshrl.u32 %v627_v32, 16  ;;  %v3258_v30 = vpack.i.b16 %v511_v27, %v483_v21 }
 0x13f   : > { %v655_v23 = vperm.slane %v649_v63, %v3149_v59  ;;  %v662_v41 = vrot.slane %v659_v16, 4  ;;  %v870_v1 = vshrl.u32 %v659_v16, 16  ;;  %v632_v49 = vrot.slane %v627_v32, 4 }
 0x140   : > { %4969 = vst [vmem:[#allocation5_spill] sm:$0xff] %v3254_v46  ;;  %v634_v50 = vrot.slane %v631_v34, 4  ;;  %v3260_v51 = vpack.i.b16 %v659_v16, %v631_v34  ;;  %v869_v52 = vshrl.u32 %v631_v34, 16  ;;  %v3263_v53 = vpack.i.b16 %v505_v58, %v477_v56 }
 0x141   : > { %v858_v43 = vshrl.u32 %v655_v23, 16  ;;  %v660_v4 = vrot.slane %v655_v23, 4  ;;  %v3265_v54 = vpack.i.b16 %v655_v23, %v627_v32  ;;  %v3270_v60 = vsel %vm458_vm10, 0, %v662_v41 }
 0x142   : > { %4970 = vst [vmem:[#allocation6_spill] sm:$0xff] %v3263_v53  ;;  %v3275_v5 = vpack.i.b16 %v870_v1, %v869_v52  ;;  %v633_v58 = vsel %vm458_vm10, 0, %v632_v49  ;;  %v3281_v8 = vsel %vm458_vm10, 0, %v634_v50  ;;  %v840_v13 = vshrl.u32 %v511_v27, 16 }
 0x143   : > { %v3272_v61 = vpack.i.b16 %v858_v43, %v857_v48  ;;  %v661_v7 = vsel %vm458_vm10, 0, %v660_v4  ;;  %v3286_v15 = vpack.i.b16 %v3270_v60, %v3281_v8  ;;  %v839_v29 = vshrl.u32 %v483_v21, 16 }
 0x144   : > { %v864_v23 = vshrl.u32 %v661_v7, 16  ;;  %v852_v32 = vshrl.u32 %v3237_v28, 16  ;;  %v851_v43 = vshrl.u32 %v485_v37, 16  ;;  %v3295_v49 = vpack.i.b16 %v661_v7, %v633_v58 }
 0x145   : > { %v3179_v19 = vpop.permute.xlu2 %395  ;;  %4971 = vst [vmem:[#allocation7_spill] sm:$0xff] %v3286_v15  ;;  %v863_v50 = vshrl.u32 %v633_v58, 16  ;;  %v3297_v52 = vpack.i.b16 %v840_v13, %v839_v29  ;;  %v1092_v13 = vshrl.u32 %v3231_v17, 16  ;;  %v1191_v16 = vshll.u32 %v3265_v54, 16 }
 0x146   : > { %v3185_v25 = vpop.permute.xlu1 %384  ;;  %v3187_v26 = vpop.permute.xlu0 %391  ;;  %4972 = vst [vmem:[#allocation8_spill] sm:$0xff] %v3295_v49  ;;  %v3307_v41 = vpack.i.b16 %v852_v32, %v851_v43 }
 0x14d   : > { %v3200_v45 = vpop.permute.xlu2 %404 }
 0x14e   : > { %v3205_v47 = vpop.permute.xlu1 %393  ;;  %v3207_v33 = vpop.permute.xlu0 %400 }
 0x155   : > { %v3221_v62 = vpop.permute.xlu2 %413 }
 0x156   : > { %v3224_v0 = vpop.permute.xlu1 %402  ;;  %v3226_v2 = vpop.permute.xlu0 %409  ;;  %v794_v21 = vrot.slane %v3221_v62, 4  ;;  %v1095_v62 = vshll.u32 %v3231_v17, 16 }
 0x157   : > { %v514_v28 = vrot.slane %v3226_v2, 4 }
 0x159   : > { %v515_v32 = vsel %vm458_vm10, %v514_v28, %v3164_v6  ;;  %v1097_v6 = vrot.slane %v1095_v62, 5 }
 0x15d   : > { %v3251_v42 = vpop.permute.xlu2 %422 }
 0x15e   : > { %v3256_v36 = vpop.permute.xlu1 %411  ;;  %v419_v24 = vpop.permute.xlu0 %418 }
 0x15f   : > { %v542_v18 = vrot.slane %v419_v24, 4  ;;  %v664_v24 = vrot.slane %v3256_v36, 4 }
 0x165   : > { %v432_v34 = vpop.permute.xlu2 %431 }
 0x166   : > { %v800_v1 = vrot.slane %v432_v34, 4  ;;  %v421_v4 = vpop.permute.xlu1 %420  ;;  %v428_v48 = vpop.permute.xlu0 %427  ;;  %v3305_v34 = vpack.i.b16 %v864_v23, %v863_v50  ;;  %v795_v23 = vsel %vm458_vm10, %v794_v21, %v3159_v3  ;;  %v1094_v21 = vrot.slane %v1092_v13, 4 }
 0x167   : > { %v520_v58 = vrot.slane %v428_v48, 4  ;;  %v799_v28 = vperm.slane %v795_v23, %v3141_v44  ;;  %v692_v50 = vrot.slane %v421_v4, 4  ;;  %v876_v4 = vshrl.u32 %v3270_v60, 16 }
 0x168   : > { %v801_v56 = vsel %vm458_vm10, %v800_v1, %v3179_v19  ;;  %v875_v19 = vshrl.u32 %v3281_v8, 16  ;;  %v812_v1 = vrot.slane %v3251_v42, 4  ;;  %v665_v60 = vsel %vm458_vm10, %v664_v24, %v3172_v11 }
 0x169   : > { %v805_v7 = vperm.slane %v801_v56, %v3141_v44  ;;  %v543_v56 = vsel %vm458_vm10, %v542_v18, %v3174_v12  ;;  %v521_v8 = vsel %vm458_vm10, %v520_v58, %v3187_v26  ;;  %v3331_v12 = vperm.slane %v515_v32, %v3141_v44 }
 0x16a   : > { %v3334_v42 = vperm.slane %v543_v56, %v3141_v44  ;;  %v813_v13 = vsel %vm458_vm10, %v812_v1, %v3170_v10  ;;  %v3342_v23 = vperm.slane %v521_v8, %v3141_v44  ;;  %v1098_v56 = vor.u32 %v1097_v6, %v1094_v21 }
 0x16b   : > { %v806_v48 = vrot.slane %v805_v7, 4  ;;  %v817_v8 = vperm.slane %v813_v13, %v3141_v44 }
 0x16c   : > { %v556_v10 = vrot.slane %v3334_v42, 4  ;;  %v526_v2 = vrot.slane %v3342_v23, 4 }
 0x16d   : > { %v441_v29 = vpop.permute.xlu2 %440  ;;  %v807_v62 = vsel %vm458_vm10, %v806_v48, %v799_v28  ;;  %v693_v28 = vsel %vm458_vm10, %v692_v50, %v3185_v25  ;;  %v996_v25 = vshrl.u32 %v3263_v53, 16  ;;  %v1119_v48 = vshll.u32 %v3249_v40, 16 }
 0x16e   : > { %v818_v18 = vrot.slane %v441_v29, 4  ;;  %v430_v7 = vpop.permute.xlu1 %429  ;;  %v437_v43 = vpop.permute.xlu0 %436  ;;  %v3376_v11 = vperm.slane %v693_v28, %v3141_v44  ;;  %v527_v22 = vsel %vm458_vm10, %v526_v2, %v3331_v12 }
 0x16f   : > { %v548_v26 = vrot.slane %v437_v43, 4  ;;  %v528_v43 = vrot.slane %v3331_v12, 4  ;;  %v670_v6 = vrot.slane %v430_v7, 4 }
 0x170   : > { %v819_v32 = vsel %vm458_vm10, %v818_v18, %v3200_v45  ;;  %v811_v45 = vperm.slane %v807_v62, %v3149_v59 }
 0x171   : > { %v823_v29 = vperm.slane %v819_v32, %v3141_v44  ;;  %v549_v36 = vsel %vm458_vm10, %v548_v26, %v3207_v33  ;;  %v529_v21 = vsel %vm458_vm10, %v3342_v23, %v528_v43  ;;  %v3372_v32 = vpack.i.b16 %v876_v4, %v875_v19 }
 0x172   : > { %v3353_v1 = vperm.slane %v549_v36, %v3141_v44  ;;  %v3383_v36 = vperm.slane %v665_v60, %v3141_v44  ;;  %v935_v43 = vshrl.u32 %v811_v45, 16  ;;  %v999_v19 = vshll.u32 %v3263_v53, 16 }
 0x173   : > { %v824_v33 = vrot.slane %v823_v29, 4  ;;  %v3380_v29 = vrot.slane %v1098_v56, 4  ;;  %v671_v28 = vsel %vm458_vm10, %v670_v6, %v3205_v47  ;;  %v1284_v47 = vshrl.u32 %v3260_v51, 16 }
 0x174   : > { %v557_v18 = vsel %vm458_vm10, %v3353_v1, %v556_v10  ;;  %v3386_v10 = vperm.slane %v529_v21, %v3149_v59  ;;  %v706_v21 = vrot.slane %v3376_v11, 4  ;;  %v675_v6 = vperm.slane %v671_v28, %v3141_v44 }
 0x175   : > { %v825_v26 = vsel %vm458_vm10, %v824_v33, %v817_v8  ;;  %v3368_v13 = vperm.slane %v557_v18, %v3149_v59  ;;  %v3370_v62 = vpop.permute.xlu2 %449  ;;  %v3398_v18 = vrot.slane %v996_v25, 4  ;;  %v678_v58 = vrot.slane %v3383_v36, 4 }
 0x176   : > { %4973 = vst [vmem:[#allocation9_spill] sm:$0xff] %v3370_v62  ;;  %v829_v24 = vperm.slane %v825_v26, %v3149_v59  ;;  %v439_v50 = vpop.permute.xlu1 %438  ;;  %v446_v7 = vpop.permute.xlu0 %445  ;;  %v554_v35 = vrot.slane %v3353_v1, 4 }
 0x177   : > { %v698_v33 = vrot.slane %v439_v50, 4  ;;  %v3395_v56 = vpack.i.b16 %v3368_v13, %v3386_v10  ;;  %v679_v27 = vsel %vm458_vm10, %v675_v6, %v678_v58  ;;  %v1121_v58 = vrot.slane %v1119_v48, 5 }
 0x178   : > { %v3389_v4 = vpack.i.b16 %v829_v24, %v811_v45  ;;  %v936_v8 = vshrl.u32 %v829_v24, 16 }
 0x179   : > { %v699_v45 = vsel %vm458_vm10, %v698_v33, %v3224_v0  ;;  %v1116_v0 = vshrl.u32 %v3249_v40, 16 }
 0x17a   : > { %4974 = vst [vmem:[#allocation10_spill] sm:$0xff] %v3389_v4  ;;  %v3401_v26 = vpack.i.b16 %v936_v8, %v935_v43  ;;  %v703_v24 = vperm.slane %v699_v45, %v3141_v44  ;;  %v1504_v50 = vshll.u32 %v3389_v4, 16  ;;  %v1508_v25 = vshrl.u32 %v3389_v4, 16 }
 0x17b   : > { %v3411_v43 = vrot.slane %v999_v19, 5  ;;  %v1287_v8 = vshll.u32 %v3260_v51, 16  ;;  %v1565_v45 = vunpack.c.l.b16 %v3395_v56  ;;  %v4887_v37 = vrot.slane %v3389_v4, 5 }
 0x17c   : > { %4975 = vst [vmem:[#allocation11_spill] sm:$0xff] %v3401_v26  ;;  %v707_v33 = vsel %vm458_vm10, %v703_v24, %v706_v21  ;;  %v3416_v60 = vrot.slane %v1504_v50, 5  ;;  %v1510_v3 = vrot.slane %v1508_v25, 4  ;;  %v1188_v19 = vshrl.u32 %v3265_v54, 16 }
 0x17d   : > { %v3418_v28 = vpop.permute.xlu2 %455  ;;  %v574_v21 = vperm.slane %v446_v7, %v3141_v44  ;;  %v1286_v50 = vrot.slane %v1284_v47, 4  ;;  %v3429_v63 = vperm.slane %v707_v33, %v3149_v59  ;;  %v1289_v55 = vrot.slane %v1287_v8, 5 }
 0x17e   : > { %4976 = vst [vmem:[#allocation12_spill] sm:$0xff] %v3416_v60  ;;  %v1511_v57 = vor.u32 %v1510_v3, %v3416_v60  ;;  %v988_v25 = vpack.i.b16 %v3418_v28, %v3370_v62  ;;  %v3437_v20 = vpack.c.b16 %v1565_v45, %v1564_v38  ;;  %v1118_v23 = vrot.slane %v1116_v0, 4  ;;  %v448_v12 = vpop.permute.xlu1 %447 }
 0x17f   : > { %4977 = vst [vmem:[#allocation13_spill] sm:$0xff] %v3418_v28  ;;  %v3440_v7 = vperm.slane %v679_v27, %v3149_v59  ;;  %v1522_v47 = vrot.slane %v4887_v37, 4  ;;  %v676_v8 = vrot.slane %v675_v6, 4  ;;  %v704_v14 = vrot.slane %v703_v24, 4 }
 0x180   : > { %4978 = vst [vmem:[#allocation14_spill] sm:$0xff] %v3437_v20  ;;  %v1514_v33 = vshll.u32 %v988_v25, 16  ;;  %v1523_v3 = vrot.slane %v988_v25, 5  ;;  %v575_v1 = vrot.slane %v574_v21, 4  ;;  %1773 = vrot.lane.b32.xlu2 %v3437_v20, %s3016_s11  ;;  %v3454_v27 = vrot.slane %v1511_v57, 4 }
 0x181   : > { %v3464_v6 = vpack.i.b16 %v3429_v63, %v3440_v7  ;;  %v555_v24 = vsel %vm458_vm10, %v554_v35, %v3334_v42  ;;  %v1190_v45 = vrot.slane %v1188_v19, 4  ;;  %v1193_v25 = vrot.slane %v1191_v16, 5 }
 0x182   : > { %4981 = vst [vmem:[#allocation15_spill] sm:$0xff] %v3454_v27  ;;  %v3456_v48 = vrot.slane %v1514_v33, 5  ;;  %v3460_v2 = vsel %vm3448_vm15, %v1522_v47, %v1523_v3  ;;  %v1002_v35 = vor.u32 %v3411_v43, %v3398_v18  ;;  %v1290_v42 = vor.u32 %v1289_v55, %v1286_v50 }
 0x183   : > { %4983 = vst [vmem:[#allocation17_spill] sm:$0xff] %v3460_v2  ;;  %v533_v3 = vperm.slane %v527_v22, %v3149_v59  ;;  %v576_v37 = vsel %vm458_vm10, 0, %v575_v1  ;;  %v724_v20 = vperm.slane %v448_v12, %v3141_v44  ;;  %v1122_v57 = vor.u32 %v1121_v58, %v1118_v23 }
 0x184   : > { %4982 = vst [vmem:[#allocation16_spill] sm:$0xff] %v3456_v48  ;;  %v677_v16 = vsel %vm458_vm10, %v676_v8, %v3383_v36  ;;  %v3488_v19 = vperm.slane %v555_v24, %v3149_v59  ;;  %v705_v47 = vsel %vm458_vm10, %v704_v14, %v3376_v11  ;;  %v1581_v33 = vunpack.c.l.b16 %v3464_v6 }
 0x185   : > { %v3494_v55 = vperm.slane %v574_v21, %v3149_v59  ;;  %v1765_v22 = vunpack.c.l.b16 %v3389_v4  ;;  %v1194_v18 = vor.u32 %v1193_v25, %v1190_v45  ;;  %v540_v50 = vrot.slane %v3386_v10, 4 }
 0x186   : > { %v3500_v36 = vperm.slane %v576_v37, %v3149_v59  ;;  %v4986_v23 = vunpack.c.l.b16 %v3260_v51  ;;  %v3508_v11 = vperm.slane %v677_v16, %v3149_v59  ;;  %v3511_v21 = vperm.slane %v705_v47, %v3149_v59  ;;  %v454_v26 = vpop.permute.xlu1 %453 }
 0x187   : > { %v725_v8 = vrot.slane %v724_v20, 4  ;;  %v3513_v1 = vrot.slane %v1002_v35, 4  ;;  %v888_v37 = vshrl.u32 %v3488_v19, 16  ;;  %v538_v12 = vrot.slane %v533_v3, 4 }
 0x188   : > { %v3504_v58 = vpack.c.b16 %v1581_v33, %v4986_v23  ;;  %v3518_v24 = vrot.slane %v1290_v42, 4  ;;  %v3520_v45 = vrot.slane %v1122_v57, 4  ;;  %v585_v25 = vrot.slane %v3494_v55, 4 }
 0x189   : > { %4988 = vst [vmem:[#allocation19_spill] sm:$0xff] %v3513_v1  ;;  %v4991_v33 = vunpack.c.l.b16 %v3241_v31  ;;  %v899_v47 = vshrl.u32 %v3386_v10, 16  ;;  %v3528_v35 = vrot.slane %v1194_v18, 4  ;;  %v587_v23 = vrot.slane %v3500_v36, 4 }
 0x18a   : > { %4987 = vst [vmem:[#allocation18_spill] sm:$0xff] %v3504_v58  ;;  %1789 = vrot.lane.b32.xlu1 %v3504_v58, %s3016_s11  ;;  %v887_v14 = vshrl.u32 %v533_v3, 16  ;;  %v3532_v43 = vsel %vm458_vm10, 0, %v540_v50  ;;  %v726_v57 = vsel %vm458_vm10, 0, %v725_v8  ;;  %v452_v58 = vpop.permute.xlu0 %451  ;;  %v911_v10 = vshrl.u32 %v3508_v11, 16 }
 0x18b   : > { %4989 = vst [vmem:[#allocation20_spill] sm:$0xff] %v3518_v24  ;;  %v3525_v16 = vpack.c.b16 %v1765_v22, %v4991_v33  ;;  %v3540_v22 = vpack.i.b16 %v3511_v21, %v3508_v11  ;;  %v912_v18 = vshrl.u32 %v3511_v21, 16  ;;  %v3547_v50 = vsel %vm458_vm10, 0, %v538_v12 }
 0x18c   : > { %4990 = vst [vmem:[#allocation21_spill] sm:$0xff] %v3520_v45  ;;  %v3544_v33 = vpack.i.b16 %v888_v37, %v887_v14  ;;  %v568_v48 = vrot.slane %v3368_v13, 4  ;;  %v3559_v2 = vsel %vm458_vm10, 0, %v587_v23  ;;  %v3562_v14 = vperm.slane %v724_v20, %v3149_v59 }
 0x18d   : > { %4992 = vst [vmem:[#allocation22_spill] sm:$0xff] %v3525_v16  ;;  %1797 = vrot.lane.b32.xlu2 %v3525_v16, %s3016_s11  ;;  %v3553_v16 = vsel %vm458_vm10, 0, %v585_v25  ;;  %v1573_v27 = vunpack.c.l.b16 %v3540_v22  ;;  %v3556_v60 = vpack.i.b16 %v912_v18, %v911_v10  ;;  %v3565_v37 = vperm.slane %v726_v57, %v3149_v59 }
 0x18e   : > { %4993 = vst [vmem:[#allocation23_spill] sm:$0xff] %v3528_v35  ;;  %v593_v12 = vperm.slane %v452_v58, %v3141_v44  ;;  %v4995_v8 = vunpack.c.l.b16 %v3265_v54  ;;  %v1559_v10 = vunpack.c.l.b16 %v3544_v33  ;;  %v900_v18 = vshrl.u32 %v3368_v13, 16 }
 0x18f   : > { %4994 = vst [vmem:[#allocation24_spill] sm:$0xff] %v3559_v2  ;;  %v1575_v25 = vunpack.c.l.b16 %v3556_v60  ;;  %v3577_v20 = vpack.i.b16 %v3488_v19, %v533_v3  ;;  %v941_v57 = vshrl.u32 %v3494_v55, 16  ;;  %v718_v58 = vrot.slane %v3429_v63, 4 }
 0x190   : > { %v3570_v42 = vpack.c.b16 %v1573_v27, %v4995_v8  ;;  %v3587_v13 = vsel %vm458_vm10, 0, %v568_v48  ;;  %v735_v3 = vrot.slane %v3562_v14, 4  ;;  %v594_v23 = vrot.slane %v593_v12, 4 }
 0x191   : > { %4997 = vst [vmem:[#allocation26_spill] sm:$0xff] %v3577_v20  ;;  %v599_v62 = vperm.slane %v593_v12, %v3149_v59  ;;  %v4998_v4 = vunpack.c.l.b16 %v3272_v61  ;;  %v737_v27 = vrot.slane %v3565_v37, 4  ;;  %v5000_v31 = vunpack.c.l.b16 %v3247_v39 }
 0x192   : > { %4996 = vst [vmem:[#allocation25_spill] sm:$0xff] %v3570_v42  ;;  %1781 = vrot.lane.b32.xlu0 %v3570_v42, %s3016_s11  ;;  %v3601_v42 = vpack.i.b16 %v900_v18, %v899_v47  ;;  %v743_v48 = vperm.slane %v454_v26, %v3141_v44  ;;  %v3608_v12 = vpack.i.b16 %v3587_v13, %v3532_v43  ;;  %v566_v47 = vrot.slane %v3488_v19, 4 }
 0x193   : > { %v3593_v28 = vpack.c.b16 %v1575_v25, %v4998_v4  ;;  %v3599_v9 = vpack.c.b16 %v1559_v10, %v5000_v31  ;;  %v923_v4 = vshrl.u32 %v3440_v7, 16  ;;  %v924_v25 = vshrl.u32 %v3429_v63, 16 }
 0x194   : > { %5002 = vst [vmem:[#allocation29_spill] sm:$0xff] %v3608_v12  ;;  %v1567_v31 = vunpack.c.l.b16 %v3601_v42  ;;  %v688_v44 = vrot.slane %v3508_v11, 4  ;;  %v716_v26 = vrot.slane %v3511_v21, 4  ;;  %v595_v10 = vsel %vm458_vm10, 0, %v594_v23 }
 0x195   : > { %4999 = vst [vmem:[#allocation27_spill] sm:$0xff] %v3593_v28  ;;  %1783 = vrot.lane.b32.xlu1 %v3593_v28, %s3016_s11  ;;  %1767 = vrot.lane.b32.xlu2 %v3599_v9, %s3016_s11  ;;  %v604_v18 = vrot.slane %v599_v62, 4  ;;  %v1569_v8 = vunpack.c.l.b16 %v3608_v12  ;;  %v3620_v28 = vpack.i.b16 %v924_v25, %v923_v4  ;;  %v3623_v63 = vsel %vm458_vm10, 0, %v735_v3 }
 0x196   : > { %5001 = vst [vmem:[#allocation28_spill] sm:$0xff] %v3599_v9  ;;  %v5003_v9 = vunpack.c.l.b16 %v3249_v40  ;;  %v3630_v19 = vsel %vm458_vm10, 0, %v566_v47  ;;  %v3633_v11 = vsel %vm458_vm10, 0, %v716_v26  ;;  %v940_v21 = vpack.i.b16 %v599_v62, %v3494_v55 }
 0x197   : > { %v744_v23 = vrot.slane %v743_v48, 4  ;;  %v1583_v45 = vunpack.c.l.b16 %v3620_v28  ;;  %v3639_v4 = vpack.i.b16 %v3630_v19, %v3547_v50  ;;  %v3642_v3 = vsel %vm458_vm10, 0, %v737_v27 }
 0x198   : > { %v3627_v1 = vpack.c.b16 %v1567_v31, %v5003_v9  ;;  %5005 = vst [vmem:[#allocation31_spill] sm:$0xff] %v3642_v3  ;;  %v603_v9 = vperm.slane %v595_v10, %v3149_v59  ;;  %v942_v25 = vshrl.u32 %v599_v62, 16  ;;  %v3648_v31 = vsel %vm458_vm10, 0, %v688_v44 }
 0x199   : > { %v605_v55 = vsel %vm458_vm10, 0, %v604_v18  ;;  %v749_v47 = vperm.slane %v743_v48, %v3149_v59  ;;  %v5006_v26 = vunpack.c.l.b16 %v3254_v46  ;;  %v3658_v27 = vpack.i.b16 %v3633_v11, %v3648_v31 }
 0x19a   : > { %5004 = vst [vmem:[#allocation30_spill] sm:$0xff] %v3627_v1  ;;  %1775 = vrot.lane.b32.xlu0 %v3627_v1, %s3016_s11  ;;  %v5009_v1 = vunpack.c.l.b16 %v3275_v5  ;;  %v1561_v18 = vunpack.c.l.b16 %v3639_v4  ;;  %v1015_v12 = vshll.u32 %v940_v21, 16  ;;  %v606_v62 = vrot.slane %v603_v9, 4 }
 0x19b   : > { %v3654_v24 = vpack.c.b16 %v1569_v8, %v5006_v26  ;;  %5008 = vst [vmem:[#allocation33_spill] sm:$0xff] %v3658_v27  ;;  %v745_v8 = vsel %vm458_vm10, 0, %v744_v23  ;;  %v3672_v26 = vsel %vm458_vm10, 0, %v718_v58  ;;  %v948_v46 = vshrl.u32 %v605_v55, 16 }
 0x19c   : > { %v3664_v44 = vpack.c.b16 %v1583_v45, %v5009_v1  ;;  %v1387_v10 = vrot.slane %v940_v21, 5  ;;  %v1384_v1 = vrot.slane %v3577_v20, 5  ;;  %v3677_v45 = vpack.i.b16 %v942_v25, %v941_v57 }
 0x19d   : > { %5007 = vst [vmem:[#allocation32_spill] sm:$0xff] %v3654_v24  ;;  %1777 = vrot.lane.b32.xlu1 %v3654_v24, %s3016_s11  ;;  %v754_v48 = vrot.slane %v749_v47, 4  ;;  %v1577_v3 = vunpack.c.l.b16 %v3658_v27  ;;  %v5011_v23 = vrot.slane %v3440_v7, 4  ;;  %v954_v58 = vshrl.u32 %v603_v9, 16 }
 0x19e   : > { %5010 = vst [vmem:[#allocation34_spill] sm:$0xff] %v3664_v44  ;;  %1791 = vrot.lane.b32.xlu2 %v3664_v44, %s3016_s11  ;;  %v3686_v35 = vperm.slane %v745_v8, %v3149_v59  ;;  %v5012_v21 = vunpack.c.l.b16 %v3258_v30  ;;  %v3697_v25 = vpack.i.b16 %v605_v55, %v3553_v16  ;;  %v3700_v7 = vpack.i.b16 %v603_v9, %v3500_v36 }
 0x19f   : > { %v3683_v24 = vsel %vm458_vm10, 0, %v5011_v23  ;;  %v964_v23 = vpack.i.b16 %v749_v47, %v3562_v14  ;;  %v966_v44 = vshrl.u32 %v749_v47, 16  ;;  %v3704_v59 = vsel %vm458_vm10, 0, %v606_v62 }
 0x1a0   : > { %v3690_v2 = vpack.c.b16 %v1561_v18, %v5012_v21  ;;  %v3694_v57 = vpack.i.b16 %v3672_v26, %v3683_v24  ;;  %v5015_v8 = vshrl.u32 %v3553_v16, 16  ;;  %v3710_v21 = vrot.slane %v1015_v12, 5 }
 0x1a1   : > { %v1386_v55 = vrot.slane %v1384_v1, 4  ;;  %v3716_v9 = vsel %vm458_vm10, 0, %v754_v48  ;;  %v5018_v47 = vunpack.c.l.b16 %v3295_v49  ;;  %v1440_v62 = vrot.slane %v3540_v22, 5 }
 0x1a2   : > { %5013 = vst [vmem:[#allocation35_spill] sm:$0xff] %v3690_v2  ;;  %v3708_v18 = vpack.i.b16 %v948_v46, %v5015_v8  ;;  %1769 = vrot.lane.b32.xlu0 %v3690_v2, %s3016_s11  ;;  %v5020_v46 = vshrl.u32 %v3500_v36, 16  ;;  %v3729_v12 = vpack.i.b16 %v3686_v35, %v3565_v37  ;;  %v1585_v8 = vunpack.c.l.b16 %v3694_v57 }
 0x1a3   : > { %5014 = vst [vmem:[#allocation36_spill] sm:$0xff] %v3694_v57  ;;  %v3720_v20 = vpack.c.b16 %v1577_v3, %v5018_v47  ;;  %v1388_v48 = vsel %vm3448_vm15, %v1386_v55, %v1387_v10  ;;  %v5021_v3 = vshrl.u32 %v3562_v14, 16  ;;  %v1207_v2 = vshll.u32 %v964_v23, 16 }
 0x1a4   : > { %5016 = vst [vmem:[#allocation37_spill] sm:$0xff] %v3708_v18  ;;  %v3725_v16 = vpack.i.b16 %v954_v58, %v5020_v46  ;;  %v756_v36 = vrot.slane %v3686_v35, 4  ;;  %v3744_v58 = vpack.i.b16 %v3716_v9, %v3623_v63  ;;  %v5024_v10 = vrot.slane %v3263_v53, 9 }
 0x1a5   : > { %5017 = vst [vmem:[#allocation38_spill] sm:$0xff] %v3710_v21  ;;  %v3737_v47 = vpack.i.b16 %v966_v44, %v5021_v3  ;;  %v1443_v21 = vrot.slane %v964_v23, 5  ;;  %1888 = vrot.lane.b32.xlu1 %v3720_v20, %s3017_s16  ;;  %v1468_v44 = vrot.slane %v3464_v6, 5  ;;  %v972_v23 = vshrl.u32 %v3716_v9, 16 }
 0x1a6   : > { %5019 = vst [vmem:[#allocation39_spill] sm:$0xff] %v3720_v20  ;;  %1785 = vrot.lane.b32.xlu2 %v3720_v20, %s3016_s11  ;;  %v1385_v14 = vsel %vm3448_vm15, %v5024_v10, %v1384_v1  ;;  %v1685_v55 = vunpack.c.l.b16 %v1388_v48  ;;  %v1442_v46 = vrot.slane %v1440_v62, 4  ;;  %v1412_v3 = vrot.slane %v3395_v56, 5 }
 0x1a7   : > { %5022 = vst [vmem:[#allocation40_spill] sm:$0xff] %v3737_v47  ;;  %v978_v27 = vshrl.u32 %v3686_v35, 16  ;;  %v5025_v18 = vunpack.c.l.b16 %v3286_v15  ;;  %v5027_v20 = vrot.slane %v3265_v54, 9  ;;  %v1471_v1 = vrot.slane %v3729_v12, 5 }
 0x1a8   : > { %5023 = vst [vmem:[#allocation41_spill] sm:$0xff] %v3744_v58  ;;  %v1684_v10 = vunpack.c.l.b16 %v1385_v14  ;;  %v1444_v9 = vsel %vm3448_vm15, %v1442_v46, %v1443_v21  ;;  %v1415_v48 = vrot.slane %v3700_v7, 5  ;;  %v918_v58 = vshrl.u32 %v3633_v11, 16 }
 0x1a9   : > { %v3758_v49 = vpack.c.b16 %v1585_v8, %v5025_v18  ;;  %v1441_v53 = vsel %vm3448_vm15, %v5027_v20, %v1440_v62  ;;  %v5028_v35 = vrot.slane %v3260_v51, 9  ;;  %v1470_v18 = vrot.slane %v1468_v44, 4 }
 0x1aa   : > { %v894_v20 = vshrl.u32 %v3630_v19, 16  ;;  %v906_v62 = vshrl.u32 %v3587_v13, 16  ;;  %v1716_v8 = vpack.c.b16 %v1685_v55, %v1684_v10  ;;  %v1414_v14 = vrot.slane %v1412_v3, 4 }
 0x1ab   : > { %5026 = vst [vmem:[#allocation42_spill] sm:$0xff] %v3758_v49  ;;  %1793 = vrot.lane.b32.xlu0 %v3758_v49, %s3016_s11  ;;  %v1469_v54 = vsel %vm3448_vm15, %v5028_v35, %v1468_v44  ;;  %v917_v21 = vshrl.u32 %v3648_v31, 16  ;;  %v1419_v46 = vrot.slane %v3601_v42, 5  ;;  %v1701_v11 = vunpack.c.l.b16 %v1444_v9 }
 0x1ac   : > { %v1472_v15 = vsel %vm3448_vm15, %v1470_v18, %v1471_v1  ;;  %v893_v51 = vshrl.u32 %v3547_v50, 16  ;;  %v905_v57 = vshrl.u32 %v3532_v43, 16  ;;  %v5029_v19 = vrot.slane %v3231_v17, 9 }
 0x1ad   : > { %1732 = vrot.lane.b32.xlu1 %v1716_v8, %s3018_s17  ;;  %v1416_v31 = vsel %vm3448_vm15, %v1414_v14, %v1415_v48  ;;  %v3790_v44 = vpack.i.b16 %v918_v58, %v917_v21  ;;  %v1422_v55 = vrot.slane %v3725_v16, 5  ;;  %v3793_v1 = vrot.slane %v1207_v2, 5 }
 0x1ae   : > { %v1413_v13 = vsel %vm3448_vm15, %v5029_v19, %v1412_v3  ;;  %1896 = vrot.lane.b32.xlu2 %v3758_v49, %s3017_s16  ;;  %v1700_v43 = vunpack.c.l.b16 %v1441_v53  ;;  %v3797_v50 = vpack.i.b16 %v894_v20, %v893_v51  ;;  %v3799_v10 = vpack.i.b16 %v906_v62, %v905_v57 }
 0x1af   : > { %v3802_v17 = vsel %vm458_vm10, 0, %v756_v36  ;;  %v1708_v3 = vunpack.c.l.b16 %v1469_v54  ;;  %v1709_v9 = vunpack.c.l.b16 %v1472_v15  ;;  %v1421_v48 = vrot.slane %v1419_v46, 4 }
 0x1b0   : > { %5030 = vst [vmem:[#allocation43_spill] sm:$0xff] %v3797_v50  ;;  %v3804_v58 = vpack.c.b16 %v1701_v11, %v1700_v43  ;;  %v1692_v35 = vunpack.c.l.b16 %v1413_v13  ;;  %v1693_v18 = vunpack.c.l.b16 %v1416_v31  ;;  %v930_v2 = vshrl.u32 %v3672_v26, 16 }
 0x1b1   : > { %v1579_v8 = vunpack.c.l.b16 %v3790_v44  ;;  %v5032_v53 = vrot.slane %v3249_v40, 9  ;;  %v1423_v36 = vsel %vm3448_vm15, %v1421_v48, %v1422_v55  ;;  %v1391_v54 = vrot.slane %v3544_v33, 5 }
 0x1b2   : > { %5031 = vst [vmem:[#allocation44_spill] sm:$0xff] %v3804_v58  ;;  %v1563_v15 = vunpack.c.l.b16 %v3797_v50  ;;  %v1571_v20 = vunpack.c.l.b16 %v3799_v10  ;;  %v929_v26 = vshrl.u32 %v3683_v24, 16  ;;  %v1475_v62 = vrot.slane %v3620_v28, 5 }
 0x1b3   : > { %v1420_v57 = vsel %vm3448_vm15, %v5032_v53, %v1419_v46  ;;  %1748 = vrot.lane.b32.xlu0 %v3804_v58, %s3018_s17  ;;  %v5033_v40 = vshrl.u32 %v3565_v37, 16  ;;  %v3826_v46 = vpack.c.b16 %v1709_v9, %v1708_v3  ;;  %v1394_v11 = vrot.slane %v3677_v45, 5 }
 0x1b4   : > { %v5035_v51 = vshrl.u32 %v3623_v63, 16  ;;  %v3833_v13 = vpack.c.b16 %v1693_v18, %v1692_v35  ;;  %v1695_v31 = vunpack.c.l.b16 %v1423_v36  ;;  %v3835_v24 = vpack.i.b16 %v930_v2, %v929_v26 }
 0x1b5   : > { %v3823_v14 = vpack.i.b16 %v978_v27, %v5033_v40  ;;  %5034 = vst [vmem:[#allocation45_spill] sm:$0xff] %v3826_v46  ;;  %1756 = vrot.lane.b32.xlu1 %v3826_v46, %s3018_s17  ;;  %v5037_v37 = vunpack.c.l.b16 %v3305_v34  ;;  %v1694_v43 = vunpack.c.l.b16 %v1420_v57  ;;  %v1393_v3 = vrot.slane %v1391_v54, 4 }
 0x1b6   : > { %v3831_v19 = vpack.i.b16 %v972_v23, %v5035_v51  ;;  %5036 = vst [vmem:[#allocation46_spill] sm:$0xff] %v3833_v13  ;;  %1740 = vrot.lane.b32.xlu2 %v3833_v13, %s3018_s17  ;;  %v5039_v63 = vunpack.c.l.b16 %v3297_v52  ;;  %v5041_v9 = vunpack.c.l.b16 %v3307_v41  ;;  %v5043_v35 = vrot.slane %v3247_v39, 9 }
 0x1b7   : > { %v3842_v27 = vpack.c.b16 %v1579_v8, %v5037_v37  ;;  %v5044_v2 = vrot.slane %v3275_v5, 9  ;;  %v1395_v53 = vsel %vm3448_vm15, %v1393_v3, %v1394_v11  ;;  %v1478_v57 = vrot.slane %v3823_v14, 5 }
 0x1b8   : > { %v3848_v23 = vpack.c.b16 %v1563_v15, %v5039_v63  ;;  %v3852_v48 = vpack.c.b16 %v1571_v20, %v5041_v9  ;;  %v1392_v18 = vsel %vm3448_vm15, %v5043_v35, %v1391_v54  ;;  %v1101_v36 = vshll.u32 %v3395_v56, 16 }
 0x1b9   : > { %5038 = vst [vmem:[#allocation47_spill] sm:$0xff] %v3842_v27  ;;  %v3862_v8 = vsel %vm3448_vm15, %v5044_v2, %v1475_v62  ;;  %v1105_v15 = vshrl.u32 %v3395_v56, 16  ;;  %v3869_v20 = vpack.c.b16 %v1695_v31, %v1694_v43  ;;  %v1587_v26 = vunpack.c.l.b16 %v3835_v24 }
 0x1ba   : > { %5040 = vst [vmem:[#allocation48_spill] sm:$0xff] %v3848_v23  ;;  %v1447_v54 = vrot.slane %v3556_v60, 5  ;;  %v1111_v40 = vshll.u32 %v3700_v7, 16  ;;  %v1686_v51 = vunpack.c.l.b16 %v1392_v18  ;;  %v1477_v37 = vrot.slane %v1475_v62, 4 }
 0x1bb   : > { %5042 = vst [vmem:[#allocation49_spill] sm:$0xff] %v3852_v48  ;;  %v1103_v63 = vrot.slane %v1101_v36, 5  ;;  %v1107_v9 = vrot.slane %v1105_v15, 4  ;;  %1787 = vrot.lane.b32.xlu0 %v3842_v27, %s3016_s11  ;;  %v1687_v11 = vunpack.c.l.b16 %v1395_v53  ;;  %v1710_v3 = vunpack.c.l.b16 %v3862_v8 }
 0x1bc   : > { %5045 = vst [vmem:[#allocation50_spill] sm:$0xff] %v3869_v20  ;;  %v1450_v56 = vrot.slane %v3737_v47, 5  ;;  %v1197_v31 = vshll.u32 %v3540_v22, 16  ;;  %v1479_v43 = vsel %vm3448_vm15, %v1477_v37, %v1478_v57  ;;  %v1113_v35 = vrot.slane %v1111_v40, 5 }
 0x1bd   : > { %v1104_v7 = vsel %vm3470_vm0, %v3380_v29, %v1103_v63  ;;  %v1108_v62 = vor.u32 %v1107_v9, %v1103_v63  ;;  %v5046_v18 = vunpack.c.l.b16 %v3372_v32  ;;  %v5048_v53 = vrot.slane %v3272_v61, 9  ;;  %1771 = vrot.lane.b32.xlu1 %v3848_v23, %s3016_s11  ;;  %v5049_v29 = vld [vmem:[#allocation24_spill] sm:$0xff] }
 0x1be   : > { %v1398_v36 = vrot.slane %v3639_v4, 5  ;;  %v1199_v15 = vrot.slane %v1197_v31, 5  ;;  %v1401_v57 = vrot.slane %v3697_v25, 5  ;;  %v3898_v40 = vpack.i.b16 %v3704_v59, %v5049_v29  ;;  %1779 = vrot.lane.b32.xlu2 %v3852_v48, %s3016_s11 }
 0x1bf   : > { %v3886_v2 = vpack.c.b16 %v1587_v26, %v5046_v18  ;;  %v1448_v8 = vsel %vm3448_vm15, %v5048_v53, %v1447_v54  ;;  %v1109_v37 = vrot.slane %v1108_v62, 4  ;;  %v1201_v26 = vshrl.u32 %v3540_v22, 16  ;;  %v5052_v18 = vld [vmem:[#allocation23_spill] sm:$0xff]  ;;  %v5053_v22 = vld [vmem:[#allocation29_spill] sm:$0xff] }
 0x1c0   : > { %5050 = vst [vmem:[#allocation24_spill] sm:$0xff] %v3898_v40  ;;  %v3903_v63 = vpack.c.b16 %v1687_v11, %v1686_v51  ;;  %v1711_v9 = vunpack.c.l.b16 %v1479_v43  ;;  %v1200_v31 = vsel %vm3470_vm0, %v5052_v18, %v1199_v15  ;;  %v1293_v53 = vshll.u32 %v3464_v6, 16 }
 0x1c1   : > { %5047 = vst [vmem:[#allocation51_spill] sm:$0xff] %v3886_v2  ;;  %v1449_v21 = vrot.slane %v1447_v54, 4  ;;  %v1702_v55 = vunpack.c.l.b16 %v1448_v8  ;;  %v1114_v13 = vsel %vm3470_vm0, %v1109_v37, %v1113_v35  ;;  %v1203_v62 = vrot.slane %v1201_v26, 4  ;;  %v5057_v37 = vld [vmem:[#allocation20_spill] sm:$0xff] }
 0x1c2   : > { %5051 = vst [vmem:[#allocation52_spill] sm:$0xff] %v3903_v63  ;;  %v1400_v58 = vrot.slane %v1398_v36, 4  ;;  %v1426_v46 = vrot.slane %v5053_v22, 5  ;;  %v1612_v23 = vunpack.c.l.b16 %v1104_v7  ;;  %v1613_v49 = vunpack.c.l.b16 %v1114_v13 }
 0x1c3   : > { %v1451_v51 = vsel %vm3448_vm15, %v1449_v21, %v1450_v56  ;;  %v1204_v11 = vor.u32 %v1203_v62, %v1199_v15  ;;  %v1295_v43 = vrot.slane %v1293_v53, 5  ;;  %v1297_v18 = vshrl.u32 %v3464_v6, 16  ;;  %1742 = vrot.lane.b32.xlu0 %v3869_v20, %s3018_s17  ;;  %v5056_v21 = vld [vmem:[#allocation26_spill] sm:$0xff] }
 0x1c4   : > { %v5054_v54 = vrot.slane %v3258_v30, 9  ;;  %v1402_v8 = vsel %vm3448_vm15, %v1400_v58, %v1401_v57  ;;  %v3923_v7 = vpack.c.b16 %v1613_v49, %v1612_v23  ;;  %v1303_v13 = vshll.u32 %v3729_v12, 16  ;;  %v5059_v58 = vld [vmem:[#allocation5_spill] sm:$0xff] }
 0x1c5   : > { %v1005_v56 = vshll.u32 %v5056_v21, 16  ;;  %v1009_v15 = vshrl.u32 %v5056_v21, 16  ;;  %v1205_v6 = vrot.slane %v1204_v11, 4  ;;  %v1296_v26 = vsel %vm3470_vm0, %v5057_v37, %v1295_v43  ;;  %1795 = vrot.lane.b32.xlu1 %v3886_v2, %s3016_s11  ;;  %v5061_v11 = vld [vmem:[#allocation36_spill] sm:$0xff] }
 0x1c6   : > { %v1399_v35 = vsel %vm3448_vm15, %v5054_v54, %v1398_v36  ;;  %5055 = vst [vmem:[#allocation23_spill] sm:$0xff] %v3923_v7  ;;  %v1703_v53 = vunpack.c.l.b16 %v1451_v51  ;;  %v1429_v62 = vrot.slane %v3898_v40, 5  ;;  %v5058_v36 = vld [vmem:[#allocation31_spill] sm:$0xff]  ;;  %v1299_v49 = vrot.slane %v1297_v18, 4  ;;  %1734 = vrot.lane.b32.xlu2 %v3903_v63, %s3018_s17 }
 0x1c7   : > { %v3934_v54 = vpack.i.b16 %v3802_v17, %v5058_v36  ;;  %v1689_v12 = vunpack.c.l.b16 %v1402_v8  ;;  %v5060_v23 = vrot.slane %v5059_v58, 9  ;;  %v1482_v48 = vrot.slane %v5061_v11, 5 }
 0x1c8   : > { %v1210_v51 = vsel %vm3470_vm0, %v1205_v6, %v3793_v1  ;;  %v1620_v37 = vunpack.c.l.b16 %v1200_v31  ;;  %v1300_v27 = vor.u32 %v1299_v49, %v1295_v43  ;;  %v1305_v21 = vrot.slane %v1303_v13, 5  ;;  %v5064_v43 = vld [vmem:[#allocation33_spill] sm:$0xff] }
 0x1c9   : > { %v1427_v57 = vsel %vm3448_vm15, %v5060_v23, %v1426_v46  ;;  %v1621_v18 = vunpack.c.l.b16 %v1210_v51  ;;  %v3948_v2 = vpack.c.b16 %v1711_v9, %v1710_v3  ;;  %v1428_v8 = vrot.slane %v1426_v46, 4  ;;  %v5066_v9 = vld [vmem:[#allocation41_spill] sm:$0xff] }
 0x1ca   : > { %v3950_v20 = vrot.slane %v1005_v56, 5  ;;  %v1011_v40 = vrot.slane %v1009_v15, 4  ;;  %v1688_v23 = vunpack.c.l.b16 %v1399_v35  ;;  %v1485_v22 = vrot.slane %v3934_v54, 5 }
 0x1cb   : > { %5062 = vst [vmem:[#allocation20_spill] sm:$0xff] %v3948_v2  ;;  %v3953_v58 = vpack.c.b16 %v1621_v18, %v1620_v37  ;;  %v1301_v47 = vrot.slane %v1300_v27, 4  ;;  %v3955_v1 = vpack.c.b16 %v1703_v53, %v1702_v55  ;;  %v1430_v31 = vsel %vm3448_vm15, %v1428_v8, %v1429_v62  ;;  %1861 = vrot.lane.b32.xlu0 %v3948_v2, %s3019_s18  ;;  %v5067_v55 = vld [vmem:[#allocation7_spill] sm:$0xff]  ;;  %v5071_v8 = vld [vmem:[#allocation37_spill] sm:$0xff] }
 0x1cc   : > { %v1696_v6 = vunpack.c.l.b16 %v1427_v57  ;;  %v1454_v13 = vrot.slane %v5064_v43, 5  ;;  %v3962_v46 = vpack.c.b16 %v1689_v12, %v1688_v23  ;;  %v1484_v3 = vrot.slane %v1482_v48, 4 }
 0x1cd   : > { %5063 = vst [vmem:[#allocation31_spill] sm:$0xff] %v3955_v1  ;;  %v1457_v35 = vrot.slane %v5066_v9, 5  ;;  %v1306_v27 = vsel %vm3470_vm0, %v1301_v47, %v1305_v21  ;;  %v5068_v56 = vrot.slane %v5067_v55, 9  ;;  %v1012_v53 = vor.u32 %v1011_v40, %v3950_v20  ;;  %1750 = vrot.lane.b32.xlu1 %v3955_v1, %s3018_s17  ;;  %v5069_v40 = vld [vmem:[#allocation8_spill] sm:$0xff] }
 0x1ce   : > { %5065 = vst [vmem:[#allocation36_spill] sm:$0xff] %v3962_v46  ;;  %v1628_v62 = vunpack.c.l.b16 %v1296_v26  ;;  %v1629_v49 = vunpack.c.l.b16 %v1306_v27  ;;  %v1486_v57 = vsel %vm3448_vm15, %v1484_v3, %v1485_v22  ;;  %v1405_v12 = vrot.slane %v3797_v50, 5  ;;  %1758 = vrot.lane.b32.xlu2 %v3948_v2, %s3018_s17 }
 0x1cf   : > { %v1483_v15 = vsel %vm3448_vm15, %v5068_v56, %v1482_v48  ;;  %v1125_v51 = vshll.u32 %v3601_v42, 16  ;;  %v1129_v37 = vshrl.u32 %v3601_v42, 16  ;;  %v1697_v47 = vunpack.c.l.b16 %v1430_v31 }
 0x1d0   : > { %v1456_v21 = vrot.slane %v1454_v13, 4  ;;  %v3979_v18 = vpack.c.b16 %v1629_v49, %v1628_v62  ;;  %v1135_v48 = vshll.u32 %v3725_v16, 16  ;;  %v5070_v22 = vrot.slane %v5069_v40, 9  ;;  %v5072_v16 = vld [vmem:[#allocation21_spill] sm:$0xff] }
 0x1d1   : > { %v1408_v23 = vrot.slane %v5071_v8, 5  ;;  %v1127_v42 = vrot.slane %v1125_v51, 5  ;;  %v1131_v3 = vrot.slane %v1129_v37, 4  ;;  %v1712_v27 = vunpack.c.l.b16 %v1483_v15 }
 0x1d2   : > { %v1455_v26 = vsel %vm3448_vm15, %v5070_v22, %v1454_v13  ;;  %v1713_v56 = vunpack.c.l.b16 %v1486_v57  ;;  %v1458_v31 = vsel %vm3448_vm15, %v1456_v21, %v1457_v35  ;;  %v1013_v62 = vrot.slane %v1012_v53, 4  ;;  %v5073_v22 = vld [vmem:[#allocation38_spill] sm:$0xff] }
 0x1d3   : > { %v1407_v49 = vrot.slane %v1405_v12, 4  ;;  %v1128_v2 = vsel %vm3470_vm0, %v5072_v16, %v1127_v42  ;;  %v1132_v63 = vor.u32 %v1131_v3, %v1127_v42  ;;  %v1137_v9 = vrot.slane %v1135_v48, 5  ;;  %1736 = vrot.lane.b32.xlu0 %v3962_v46, %s3018_s17 }
 0x1d4   : > { %v3994_v50 = vpack.c.b16 %v1697_v47, %v1696_v6  ;;  %v1704_v13 = vunpack.c.l.b16 %v1455_v26  ;;  %v1018_v51 = vsel %vm3470_vm0, %v1013_v62, %v5073_v22  ;;  %v5074_v15 = vshrl.u32 %v5049_v29, 16 }
 0x1d5   : > { %v5075_v57 = vshrl.u32 %v3704_v59, 16  ;;  %v1705_v53 = vunpack.c.l.b16 %v1458_v31  ;;  %v1409_v37 = vsel %vm3448_vm15, %v1407_v49, %v1408_v23  ;;  %v5076_v6 = vshrl.u32 %v5058_v36, 16  ;;  %v5078_v59 = vld [vmem:[#allocation19_spill] sm:$0xff] }
 0x1d6   : > { %v5077_v47 = vshrl.u32 %v3802_v17, 16  ;;  %v1133_v48 = vrot.slane %v1132_v63, 4  ;;  %v4015_v26 = vpack.c.b16 %v1713_v56, %v1712_v27  ;;  %v1008_v29 = vsel %vm3470_vm0, %v5078_v59, %v3950_v20  ;;  %1744 = vrot.lane.b32.xlu1 %v3994_v50, %s3018_s17  ;;  %1853 = vrot.lane.b32.xlu2 %v3955_v1, %s3019_s18 }
 0x1d7   : > { %v4003_v35 = vpack.i.b16 %v5075_v57, %v5074_v15  ;;  %v5079_v42 = vrot.slane %v3297_v52, 9  ;;  %v1433_v23 = vrot.slane %v3799_v10, 5  ;;  %v1605_v36 = vunpack.c.l.b16 %v1018_v51 }
 0x1d8   : > { %v4013_v21 = vpack.i.b16 %v5077_v47, %v5076_v6  ;;  %v1489_v17 = vrot.slane %v3835_v24, 5  ;;  %v1461_v31 = vrot.slane %v3790_v44, 5  ;;  %v1138_v63 = vsel %vm3470_vm0, %v1133_v48, %v1137_v9 }
 0x1d9   : > { %v1406_v3 = vsel %vm3448_vm15, %v5079_v42, %v1405_v12  ;;  %v1691_v27 = vunpack.c.l.b16 %v1409_v37  ;;  %v1436_v20 = vrot.slane %v4003_v35, 5  ;;  %v1614_v56 = vunpack.c.l.b16 %v1128_v2 }
 0x1da   : > { %v1615_v62 = vunpack.c.l.b16 %v1138_v63  ;;  %v1604_v12 = vunpack.c.l.b16 %v1008_v29  ;;  %v1690_v49 = vunpack.c.l.b16 %v1406_v3  ;;  %v1492_v16 = vrot.slane %v4013_v21, 5 }
 0x1db   : > { %v1464_v22 = vrot.slane %v3831_v19, 5  ;;  %v1435_v51 = vrot.slane %v1433_v23, 4  ;;  %v1023_v9 = vshll.u32 %v3247_v39, 16  ;;  %v1212_v57 = vshrl.u32 %v3272_v61, 16  ;;  %1760 = vrot.lane.b32.xlu0 %v4015_v26, %s3018_s17 }
 0x1dc   : > { %v4037_v15 = vpack.c.b16 %v1615_v62, %v1614_v56  ;;  %v4041_v37 = vpack.c.b16 %v1705_v53, %v1704_v13  ;;  %v1491_v2 = vrot.slane %v1489_v17, 4  ;;  %v1463_v6 = vrot.slane %v1461_v31, 4 }
 0x1dd   : > { %v1215_v47 = vshll.u32 %v3272_v61, 16  ;;  %v1636_v48 = vpack.c.b16 %v1605_v36, %v1604_v12  ;;  %v4044_v59 = vpack.c.b16 %v1691_v27, %v1690_v49  ;;  %v5080_v29 = vrot.slane %v3307_v41, 9  ;;  %v4069_v49 = vpop.permute.xlu2 %1773 }
 0x1de   : > { %v1437_v3 = vsel %vm3448_vm15, %v1435_v51, %v1436_v20  ;;  %v5081_v13 = vrot.slane %v3372_v32, 9  ;;  %v1493_v61 = vsel %vm3448_vm15, %v1491_v2, %v1492_v16  ;;  %v5082_v36 = vrot.slane %v3305_v34, 9  ;;  %5084 = vst [vmem:[#allocation33_spill] sm:$0xff] %v4069_v49  ;;  %1660 = vrot.lane.b32.xlu1 %v3923_v7, %s2996_s20  ;;  %1752 = vrot.lane.b32.xlu2 %v4041_v37, %s3018_s17 }
 0x1df   : > { %v1434_v42 = vsel %vm3448_vm15, %v5080_v29, %v1433_v23  ;;  %v1465_v23 = vsel %vm3448_vm15, %v1463_v6, %v1464_v22  ;;  %v5083_v27 = vshrl.u32 %v3247_v39, 16  ;;  %v1025_v56 = vrot.slane %v1023_v9, 5 }
 0x1e0   : > { %v1490_v53 = vsel %vm3448_vm15, %v5081_v13, %v1489_v17  ;;  %v1462_v63 = vsel %vm3448_vm15, %v5082_v36, %v1461_v31  ;;  %v1214_v62 = vrot.slane %v1212_v57, 4  ;;  %v1044_v12 = vshrl.u32 %v3258_v30, 16 }
 0x1e1   : > { %v1022_v20 = vrot.slane %v5083_v27, 4  ;;  %v1029_v17 = vshll.u32 %v3544_v33, 16  ;;  %v1033_v16 = vshrl.u32 %v3544_v33, 16  ;;  %v1217_v51 = vrot.slane %v1215_v47, 5 }
 0x1e2   : > { %v1047_v2 = vshll.u32 %v3258_v30, 16  ;;  %v1698_v31 = vunpack.c.l.b16 %v1434_v42  ;;  %v1699_v22 = vunpack.c.l.b16 %v1437_v3  ;;  %v1308_v39 = vshrl.u32 %v3275_v5, 16 }
 0x1e3   : > { %v1311_v9 = vshll.u32 %v3275_v5, 16  ;;  %v1714_v57 = vunpack.c.l.b16 %v1490_v53  ;;  %v1715_v6 = vunpack.c.l.b16 %v1493_v61  ;;  %v1706_v29 = vunpack.c.l.b16 %v1462_v63  ;;  %1652 = vrot.lane.b32.xlu0 %v1636_v48, %s2996_s20 }
 0x1e4   : > { %v1707_v13 = vunpack.c.l.b16 %v1465_v23  ;;  %v1026_v33 = vor.u32 %v1025_v56, %v1022_v20  ;;  %v1221_v47 = vshll.u32 %v3556_v60, 16  ;;  %v1225_v30 = vshrl.u32 %v3556_v60, 16 }
 0x1e5   : > { %v1046_v36 = vrot.slane %v1044_v12, 4  ;;  %v1031_v27 = vrot.slane %v1029_v17, 5  ;;  %v1035_v42 = vrot.slane %v1033_v16, 4  ;;  %v1218_v3 = vor.u32 %v1217_v51, %v1214_v62 }
 0x1e6   : > { %v1049_v49 = vrot.slane %v1047_v2, 5  ;;  %v1053_v1 = vshll.u32 %v3639_v4, 16  ;;  %v1057_v5 = vshrl.u32 %v3639_v4, 16  ;;  %v1310_v7 = vrot.slane %v1308_v39, 4  ;;  %1738 = vrot.lane.b32.xlu1 %v4044_v59, %s3018_s17  ;;  %1668 = vrot.lane.b32.xlu2 %v3953_v58, %s2996_s20 }
 0x1e7   : > { %v1313_v46 = vrot.slane %v1311_v9, 5  ;;  %v4085_v53 = vpack.c.b16 %v1699_v22, %v1698_v31  ;;  %v4087_v61 = vpack.c.b16 %v1715_v6, %v1714_v57  ;;  %v1317_v63 = vshll.u32 %v3620_v28, 16 }
 0x1e8   : > { %v1321_v60 = vshrl.u32 %v3620_v28, 16  ;;  %v4091_v23 = vpack.c.b16 %v1707_v13, %v1706_v29  ;;  %v4093_v20 = vrot.slane %v1221_v47, 5  ;;  %v1227_v56 = vrot.slane %v1225_v30, 4  ;;  %v4101_v28 = vpop.permute.xlu2 %1797  ;;  %v5087_v47 = vld [vmem:[#allocation40_spill] sm:$0xff] }
 0x1e9   : > { %v1332_v62 = vshrl.u32 %v5067_v55, 16  ;;  %v1027_v4 = vrot.slane %v1026_v33, 4  ;;  %v1036_v12 = vor.u32 %v1035_v42, %v1031_v27  ;;  %v1050_v17 = vor.u32 %v1049_v49, %v1046_v36  ;;  %5085 = vst [vmem:[#allocation7_spill] sm:$0xff] %v4101_v28 }
 0x1ea   : > { %v1335_v48 = vshll.u32 %v5067_v55, 16  ;;  %v1219_v16 = vrot.slane %v1218_v3, 4  ;;  %v1055_v51 = vrot.slane %v1053_v1, 5  ;;  %v1059_v2 = vrot.slane %v1057_v5, 4 }
 0x1eb   : > { %v1314_v31 = vor.u32 %v1313_v46, %v1310_v7  ;;  %v5086_v22 = vshll.u32 %v3677_v45, 16  ;;  %v1063_v9 = vshll.u32 %v3697_v25, 16  ;;  %v4106_v49 = vrot.slane %v1317_v63, 5  ;;  %1676 = vrot.lane.b32.xlu0 %v3979_v18, %s2996_s20  ;;  %v5089_v63 = vld [vmem:[#allocation5_spill] sm:$0xff] }
 0x1ec   : > { %v1323_v55 = vrot.slane %v1321_v60, 4  ;;  %v1228_v57 = vor.u32 %v1227_v56, %v4093_v20  ;;  %v1334_v6 = vrot.slane %v1332_v62, 4  ;;  %v1341_v1 = vshll.u32 %v5061_v11, 16 }
 0x1ed   : > { %v1041_v39 = vrot.slane %v5086_v22, 5  ;;  %v1345_v7 = vshrl.u32 %v5061_v11, 16  ;;  %v1037_v46 = vrot.slane %v1036_v12, 4  ;;  %v1051_v29 = vrot.slane %v1050_v17, 4 }
 0x1ee   : > { %v1327_v13 = vshll.u32 %v3823_v14, 16  ;;  %v1337_v33 = vrot.slane %v1335_v48, 5  ;;  %v1032_v45 = vsel %vm3470_vm0, %v1027_v4, %v1031_v27  ;;  %v5088_v25 = vshll.u32 %v5087_v47, 16  ;;  %1762 = vrot.lane.b32.xlu1 %v4087_v61, %s3018_s17  ;;  %1746 = vrot.lane.b32.xlu2 %v4085_v53, %s3018_s17 }
 0x1ef   : > { %v1060_v36 = vor.u32 %v1059_v2, %v1055_v51  ;;  %v1315_v42 = vrot.slane %v1314_v31, 4  ;;  %v1042_v3 = vsel %vm3470_vm0, %v1037_v46, %v1041_v39  ;;  %v1065_v11 = vrot.slane %v1063_v9, 5 }
 0x1f0   : > { %v1233_v30 = vrot.slane %v5088_v25, 5  ;;  %v1324_v5 = vor.u32 %v1323_v55, %v4106_v49  ;;  %v1140_v14 = vshrl.u32 %v5089_v63, 16  ;;  %v1229_v60 = vrot.slane %v1228_v57, 4  ;;  %v4139_v46 = vpop.permute.xlu2 %1767 }
 0x1f1   : > { %v1343_v56 = vrot.slane %v1341_v1, 5  ;;  %v1347_v62 = vrot.slane %v1345_v7, 4  ;;  %v1143_v27 = vshll.u32 %v5089_v63, 16  ;;  %v1606_v4 = vunpack.c.l.b16 %v1032_v45 }
 0x1f2   : > { %v1224_v12 = vsel %vm3470_vm0, %v1219_v16, %v4093_v20  ;;  %v1329_v17 = vrot.slane %v1327_v13, 5  ;;  %v1338_v48 = vor.u32 %v1337_v33, %v1334_v6  ;;  %v1607_v2 = vunpack.c.l.b16 %v1042_v3  ;;  %v5090_v13 = vld [vmem:[#allocation29_spill] sm:$0xff] }
 0x1f3   : > { %v1234_v31 = vsel %vm3470_vm0, %v1229_v60, %v1233_v30  ;;  %v1056_v22 = vsel %vm3470_vm0, %v1051_v29, %v1055_v51  ;;  %v1061_v39 = vrot.slane %v1060_v36, 4  ;;  %v1325_v9 = vrot.slane %v1324_v5, 4  ;;  %1754 = vrot.lane.b32.xlu0 %v4091_v23, %s3018_s17 }
 0x1f4   : > { %v1351_v55 = vshll.u32 %v3934_v54, 16  ;;  %v1142_v20 = vrot.slane %v1140_v14, 4  ;;  %v1260_v16 = vshrl.u32 %v3305_v34, 16  ;;  %v1348_v6 = vor.u32 %v1347_v62, %v1343_v56 }
 0x1f5   : > { %v1066_v57 = vsel %vm3470_vm0, %v1061_v39, %v1065_v11  ;;  %v1145_v1 = vrot.slane %v1143_v27, 5  ;;  %v1263_v7 = vshll.u32 %v3305_v34, 16  ;;  %v1330_v51 = vsel %vm3470_vm0, %v1325_v9, %v1329_v17 }
 0x1f6   : > { %v1339_v29 = vrot.slane %v1338_v48, 4  ;;  %v1149_v33 = vshll.u32 %v5090_v13, 16  ;;  %v1153_v54 = vshrl.u32 %v5090_v13, 16  ;;  %v4145_v45 = vpack.c.b16 %v1607_v2, %v1606_v4  ;;  %1662 = vrot.lane.b32.xlu2 %v4037_v15, %s2996_s20 }
 0x1f7   : > { %v1622_v47 = vunpack.c.l.b16 %v1224_v12  ;;  %v1623_v25 = vunpack.c.l.b16 %v1234_v31  ;;  %v1608_v30 = vunpack.c.l.b16 %v1056_v22  ;;  %v1609_v36 = vunpack.c.l.b16 %v1066_v57  ;;  %v5091_v31 = vld [vmem:[#allocation24_spill] sm:$0xff] }
 0x1f8   : > { %v1320_v34 = vsel %vm3470_vm0, %v1315_v42, %v4106_v49  ;;  %v1353_v3 = vrot.slane %v1351_v55, 5  ;;  %v1262_v11 = vrot.slane %v1260_v16, 4  ;;  %v1631_v5 = vunpack.c.l.b16 %v1330_v51  ;;  %1654 = vrot.lane.b32.xlu1 %v4145_v45, %s2996_s20 }
 0x1f9   : > { %v1349_v63 = vrot.slane %v1348_v6, 4  ;;  %v1146_v14 = vor.u32 %v1145_v1, %v1142_v20  ;;  %v1265_v60 = vrot.slane %v1263_v7, 5  ;;  %v1151_v62 = vrot.slane %v1149_v33, 5 }
 0x1fa   : > { %v1155_v27 = vrot.slane %v1153_v54, 4  ;;  %v1236_v4 = vshrl.u32 %v5069_v40, 16  ;;  %v1239_v12 = vshll.u32 %v5069_v40, 16  ;;  %v1630_v17 = vunpack.c.l.b16 %v1320_v34 }
 0x1fb   : > { %v1344_v48 = vsel %vm3470_vm0, %v1339_v29, %v1343_v56  ;;  %v1269_v49 = vshll.u32 %v3790_v44, 16  ;;  %v1273_v42 = vshrl.u32 %v3790_v44, 16  ;;  %v1354_v2 = vsel %vm3470_vm0, %v1349_v63, %v1353_v3  ;;  %v4173_v44 = vpop.permute.xlu2 %1791 }
 0x1fc   : > { %v1159_v22 = vshll.u32 %v5091_v31, 16  ;;  %v1245_v40 = vshll.u32 %v5064_v43, 16  ;;  %v1249_v39 = vshrl.u32 %v5064_v43, 16  ;;  %v4167_v9 = vpack.c.b16 %v1623_v25, %v1622_v47 }
 0x1fd   : > { %v4169_v55 = vpack.c.b16 %v1609_v36, %v1608_v30  ;;  %v4171_v56 = vpack.c.b16 %v1631_v5, %v1630_v17  ;;  %v1147_v20 = vrot.slane %v1146_v14, 4  ;;  %v1156_v16 = vor.u32 %v1155_v27, %v1151_v62  ;;  %v5092_v36 = vld [vmem:[#allocation43_spill] sm:$0xff]  ;;  %v5093_v14 = vld [vmem:[#allocation41_spill] sm:$0xff] }
 0x1fe   : > { %v1266_v57 = vor.u32 %v1265_v60, %v1262_v11  ;;  %v1238_v6 = vrot.slane %v1236_v4, 4  ;;  %v1241_v1 = vrot.slane %v1239_v12, 5  ;;  %v1632_v7 = vunpack.c.l.b16 %v1344_v48  ;;  %1670 = vrot.lane.b32.xlu0 %v4167_v9, %s2996_s20 }
 0x1ff   : > { %v1633_v51 = vunpack.c.l.b16 %v1354_v2  ;;  %v4175_v29 = vrot.slane %v1269_v49, 5  ;;  %v1275_v13 = vrot.slane %v1273_v42, 4  ;;  %v1152_v43 = vsel %vm3470_vm0, %v1147_v20, %v1151_v62  ;;  %v4190_v62 = vpop.permute.xlu1 %1789  ;;  %1656 = vrot.lane.b32.xlu2 %v4169_v55, %s2996_s20 }
 0x200   : > { %v1161_v33 = vrot.slane %v1159_v22, 5  ;;  %v1247_v54 = vrot.slane %v1245_v40, 5  ;;  %v1251_v47 = vrot.slane %v1249_v39, 4  ;;  %v1068_v25 = vshrl.u32 %v3297_v52, 16  ;;  %1678 = vrot.lane.b32.xlu1 %v4171_v56, %s2996_s20  ;;  %5094 = vst [vmem:[#allocation8_spill] sm:$0xff] %v4190_v62 }
 0x201   : > { %v1071_v30 = vshll.u32 %v3297_v52, 16  ;;  %v1077_v34 = vshll.u32 %v5092_v36, 16  ;;  %v1081_v3 = vshrl.u32 %v5092_v36, 16  ;;  %v1157_v11 = vrot.slane %v1156_v16, 4 }
 0x202   : > { %v4185_v5 = vrot.slane %v1266_v57, 4  ;;  %v1242_v63 = vor.u32 %v1241_v1, %v1238_v6  ;;  %v1255_v60 = vshll.u32 %v5093_v14, 16  ;;  %v4192_v27 = vpack.c.b16 %v1633_v51, %v1632_v7 }
 0x203   : > { %v1616_v4 = vunpack.c.l.b16 %v1152_v43  ;;  %v1276_v52 = vor.u32 %v1275_v13, %v4175_v29  ;;  %v1279_v12 = vshll.u32 %v3831_v19, 16  ;;  %v1162_v17 = vsel %vm3470_vm0, %v1157_v11, %v1161_v33  ;;  %v4204_v39 = vpop.permute.xlu2 %1785 }
 0x204   : > { %v1252_v48 = vor.u32 %v1251_v47, %v1247_v54  ;;  %v1173_v49 = vshll.u32 %v3799_v10, 16  ;;  %v1177_v42 = vshrl.u32 %v3799_v10, 16  ;;  %v1070_v2 = vrot.slane %v1068_v25, 4  ;;  %v4216_v36 = vpop.permute.xlu0 %1781 }
 0x205   : > { %v1073_v31 = vrot.slane %v1071_v30, 5  ;;  %v4202_v22 = vrot.slane %v1077_v34, 5  ;;  %v1083_v40 = vrot.slane %v1081_v3, 4  ;;  %v1243_v20 = vrot.slane %v1242_v63, 4  ;;  %5095 = vst [vmem:[#allocation37_spill] sm:$0xff] %v4216_v36 }
 0x206   : > { %v1257_v19 = vrot.slane %v1255_v60, 5  ;;  %v1164_v16 = vshrl.u32 %v3307_v41, 16  ;;  %v1167_v57 = vshll.u32 %v3307_v41, 16  ;;  %v1617_v6 = vunpack.c.l.b16 %v1162_v17  ;;  %1818 = vrot.lane.b32.xlu0 %v4167_v9, %s3020_s19 }
 0x207   : > { %v1277_v1 = vrot.slane %v1276_v52, 4  ;;  %v1281_v7 = vrot.slane %v1279_v12, 5  ;;  %v1087_v51 = vshll.u32 %v5071_v8, 16  ;;  %v1248_v10 = vsel %vm3470_vm0, %v1243_v20, %v1247_v54  ;;  %1680 = vrot.lane.b32.xlu2 %v4192_v27, %s2996_s20  ;;  %v4235_v17 = vpop.permute.xlu1 %1783 }
 0x208   : > { %v1253_v13 = vrot.slane %v1252_v48, 4  ;;  %v1175_v43 = vrot.slane %v1173_v49, 5  ;;  %v1179_v33 = vrot.slane %v1177_v42, 4  ;;  %v1074_v47 = vor.u32 %v1073_v31, %v1070_v2  ;;  %1826 = vrot.lane.b32.xlu1 %v4171_v56, %s3020_s19 }
 0x209   : > { %v1084_v25 = vor.u32 %v1083_v40, %v4202_v22  ;;  %v1365_v41 = vshll.u32 %v3835_v24, 16  ;;  %v1369_v30 = vshrl.u32 %v3835_v24, 16  ;;  %v1166_v34 = vrot.slane %v1164_v16, 4 }
 0x20a   : > { %v1258_v8 = vsel %vm3470_vm0, %v1253_v13, %v1257_v19  ;;  %v1169_v3 = vrot.slane %v1167_v57, 5  ;;  %v1183_v11 = vshll.u32 %v4003_v35, 16  ;;  %v1282_v54 = vsel %vm3470_vm0, %v1277_v1, %v1281_v7 }
 0x20b   : > { %v1089_v63 = vrot.slane %v1087_v51, 5  ;;  %v1356_v14 = vshrl.u32 %v3372_v32, 16  ;;  %v1359_v24 = vshll.u32 %v3372_v32, 16  ;;  %v4229_v60 = vpack.c.b16 %v1617_v6, %v1616_v4  ;;  %v4237_v31 = vpop.permute.xlu2 %1896 }
 0x20c   : > { %v1272_v35 = vsel %vm3470_vm0, %v4185_v5, %v4175_v29  ;;  %v1624_v52 = vunpack.c.l.b16 %v1248_v10  ;;  %v1180_v12 = vor.u32 %v1179_v33, %v1175_v43  ;;  %v1625_v48 = vunpack.c.l.b16 %v1258_v8  ;;  %v4249_v10 = vpop.permute.xlu0 %1775 }
 0x20d   : > { %v1085_v49 = vrot.slane %v1084_v25, 4  ;;  %v1367_v42 = vrot.slane %v1365_v41, 5  ;;  %v1371_v2 = vrot.slane %v1369_v30, 4  ;;  %v1627_v32 = vunpack.c.l.b16 %v1282_v54 }
 0x20e   : > { %v1075_v40 = vrot.slane %v1074_v47, 4  ;;  %v1170_v20 = vor.u32 %v1169_v3, %v1166_v34  ;;  %v1185_v4 = vrot.slane %v1183_v11, 5  ;;  %v1358_v16 = vrot.slane %v1356_v14, 4  ;;  %1664 = vrot.lane.b32.xlu0 %v4229_v60, %s2996_s20 }
 0x20f   : > { %v1090_v19 = vsel %vm3470_vm0, %v1085_v49, %v1089_v63  ;;  %v1361_v57 = vrot.slane %v1359_v24, 5  ;;  %v1375_v29 = vshll.u32 %v4013_v21, 16  ;;  %v1626_v5 = vunpack.c.l.b16 %v1272_v35  ;;  %v4261_v8 = vpop.permute.xlu1 %1777 }
 0x210   : > { %v1181_v6 = vrot.slane %v1180_v12, 4  ;;  %v4244_v1 = vpack.c.b16 %v1625_v48, %v1624_v52  ;;  %v1080_v7 = vsel %vm3470_vm0, %v1075_v40, %v4202_v22  ;;  %v1372_v51 = vor.u32 %v1371_v2, %v1367_v42  ;;  %5096 = vst [vmem:[#allocation21_spill] sm:$0xff] %v4261_v8  ;;  %v5125_v8 = vld [vmem:[#allocation47_spill] sm:$0xff] }
 0x211   : > { %v4251_v13 = vpack.c.b16 %v1627_v32, %v1626_v5  ;;  %v1611_v33 = vunpack.c.l.b16 %v1090_v19  ;;  %v1171_v47 = vrot.slane %v1170_v20, 4  ;;  %v1362_v25 = vor.u32 %v1361_v57, %v1358_v16  ;;  %v5100_v19 = vld [vmem:[#allocation4_spill] sm:$0xff] }
 0x212   : > { %v1186_v21 = vsel %vm3470_vm0, %v1181_v6, %v1185_v4  ;;  %1672 = vrot.lane.b32.xlu1 %v4244_v1, %s2996_s20  ;;  %v1377_v41 = vrot.slane %v1375_v29, 5  ;;  %v1610_v30 = vunpack.c.l.b16 %v1080_v7  ;;  %v1373_v3 = vrot.slane %v1372_v51, 4  ;;  %v5101_v29 = vld [vmem:[#allocation13_spill] sm:$0xff] }
 0x213   : > { %1674 = vrot.lane.b32.xlu2 %v4251_v13, %s2996_s20  ;;  %v1176_v22 = vsel %vm3470_vm0, %v1171_v47, %v1175_v43  ;;  %v1619_v34 = vunpack.c.l.b16 %v1186_v21  ;;  %v4263_v11 = vpop.permute.xlu2 %1740  ;;  %v1363_v14 = vrot.slane %v1362_v25, 4  ;;  %v1495_v16 = vshrl.u32 %v5100_v19, 16 }
 0x214   : > { %v4265_v54 = vpack.c.b16 %v1611_v33, %v1610_v30  ;;  %v1618_v63 = vunpack.c.l.b16 %v1176_v22  ;;  %v1378_v24 = vsel %vm3470_vm0, %v1373_v3, %v1377_v41  ;;  %v4275_v52 = vpop.permute.xlu0 %1769  ;;  %v1498_v57 = vshll.u32 %v5100_v19, 16  ;;  %v5102_v33 = vld [vmem:[#allocation9_spill] sm:$0xff] }
 0x215   : > { %v1368_v43 = vsel %vm3470_vm0, %v1363_v14, %v1367_v42  ;;  %5097 = vst [vmem:[#allocation38_spill] sm:$0xff] %v4275_v52  ;;  %v1635_v12 = vunpack.c.l.b16 %v1378_v24  ;;  %v5099_v42 = vld [vmem:[#allocation3_spill] sm:$0xff]  ;;  %v990_v5 = vshrl.u32 %v5101_v29, 16  ;;  %v989_v47 = vshrl.u32 %v5102_v33, 16 }
 0x216   : > { %1658 = vrot.lane.b32.xlu0 %v4265_v54, %s2996_s20  ;;  %v4271_v35 = vpack.c.b16 %v1619_v34, %v1618_v63  ;;  %v1634_v48 = vunpack.c.l.b16 %v1368_v43  ;;  %v1526_v40 = vshrl.u32 %v5099_v42, 16  ;;  %v1529_v20 = vshll.u32 %v5099_v42, 16  ;;  %v5103_v14 = vld [vmem:[#allocation11_spill] sm:$0xff] }
 0x217   : > { %v4281_v49 = vpop.permute.xlu1 %1888  ;;  %v1497_v25 = vrot.slane %v1495_v16, 4  ;;  %v1500_v41 = vrot.slane %v1498_v57, 5  ;;  %v991_v30 = vpack.i.b16 %v990_v5, %v989_v47  ;;  %v1869_v63 = vunpack.c.l.b16 %v5099_v42  ;;  %v5104_v16 = vld [vmem:[#allocation35_spill] sm:$0xff] }
 0x218   : > { %v4285_v32 = vpack.c.b16 %v1635_v12, %v1634_v48  ;;  %v1528_v7 = vrot.slane %v1526_v40, 4  ;;  %v1531_v51 = vrot.slane %v1529_v20, 5  ;;  %v1870_v24 = vunpack.c.l.b16 %v5103_v14 }
 0x219   : > { %v1501_v3 = vor.u32 %v1500_v41, %v1497_v25  ;;  %v1535_v43 = vshll.u32 %v5103_v14, 16  ;;  %v1539_v12 = vshrl.u32 %v5103_v14, 16  ;;  %v2782_v48 = vrot.slane %v5099_v42, 9  ;;  %v5105_v25 = vld [vmem:[#allocation10_spill] sm:$0xff] }
 0x21a   : > { %1666 = vrot.lane.b32.xlu1 %v4271_v35, %s2996_s20  ;;  %v1532_v22 = vor.u32 %v1531_v51, %v1528_v7  ;;  %v1551_v40 = vrot.slane %v5103_v14, 5  ;;  %v1545_v20 = vshll.u32 %v991_v30, 16  ;;  %v2781_v57 = vrot.slane %v5100_v19, 9  ;;  %v5107_v19 = vld [vmem:[#allocation17_spill] sm:$0xff] }
 0x21b   : > { %1958 = vrot.lane.b32.xlu2 %v4041_v37, %s3021_s21  ;;  %v4283_v2 = vpop.permute.xlu2 %1779  ;;  %v4320_v29 = vpack.c.b16 %v1870_v24, %v1869_v63  ;;  %v1541_v51 = vrot.slane %v1539_v12, 4  ;;  %v1502_v42 = vrot.slane %v1501_v3, 4  ;;  %v5106_v41 = vrot.slane %v5105_v25, 5  ;;  %v5110_v25 = vld [vmem:[#allocation16_spill] sm:$0xff] }
 0x21c   : > { %5098 = vst [vmem:[#allocation19_spill] sm:$0xff] %v4283_v2  ;;  %v1533_v7 = vrot.slane %v1532_v22, 4  ;;  %v1552_v33 = vsel %vm3448_vm15, %v2782_v48, %v1551_v40  ;;  %v1554_v36 = vrot.slane %v991_v30, 5  ;;  %v1835_v63 = vunpack.c.l.b16 %v5107_v19  ;;  %v5109_v48 = vld [vmem:[#allocation15_spill] sm:$0xff]  ;;  %v5123_v2 = vld [vmem:[#allocation30_spill] sm:$0xff] }
 0x21d   : > { %v4291_v4 = vpop.permute.xlu0 %1793  ;;  %v1521_v14 = vsel %vm3448_vm15, %v2781_v57, %v5106_v41  ;;  %v1547_v3 = vrot.slane %v1545_v20, 5  ;;  %v5111_v57 = vsel %vm3470_vm0, %v5109_v48, %v5110_v25  ;;  %v1553_v19 = vrot.slane %v1551_v40, 4 }
 0x21e   : > { %1682 = vrot.lane.b32.xlu0 %v4285_v32, %s2996_s20  ;;  %v1800_v30 = vunpack.c.l.b16 %v5111_v57  ;;  %v1834_v41 = vunpack.c.l.b16 %v1521_v14  ;;  %vm2274_vm10 = vcmask 293888  }
 0x21f   : > { %v4300_v6 = vpop.permute.xlu1 %1732  ;;  %v1555_v20 = vsel %vm3448_vm15, %v1553_v19, %v1554_v36  ;;  %v5115_v36 = vld [vmem:[#allocation52_spill] sm:$0xff] }
 0x222   : > { %1931 = vrot.lane.b32.xlu1 %v4192_v27, %s3022_s22 }
 0x223   : > { %1810 = vrot.lane.b32.xlu2 %v4037_v15, %s3020_s19  ;;  %v4303_v21 = vpop.permute.xlu2 %1734 }
 0x225   : > { %v4307_v34 = vpop.permute.xlu0 %1748 }
 0x226   : > { %1923 = vrot.lane.b32.xlu0 %v4244_v1, %s3022_s22 }
 0x227   : > { %v4322_v5 = vpop.permute.xlu1 %1756 }
 0x22a   : > { %1802 = vrot.lane.b32.xlu1 %v4145_v45, %s3020_s19  ;;  %v1537_v45 = vrot.slane %v1535_v43, 5  ;;  %v5108_v43 = vld [vmem:[#allocation12_spill] sm:$0xff] }
 0x22b   : > { %1872 = vrot.lane.b32.xlu2 %v5104_v16, %s3017_s16  ;;  %v4326_v47 = vpop.permute.xlu2 %1758  ;;  %v1507_v12 = vsel %vm3470_vm0, %v1502_v42, %v5108_v43  ;;  %v1939_v42 = vunpack.c.l.b16 %v1552_v33  ;;  %v1940_v43 = vunpack.c.l.b16 %v1555_v20  ;;  %v5120_v20 = vld [vmem:[#allocation51_spill] sm:$0xff] }
 0x22c   : > { %v1538_v24 = vsel %vm3470_vm0, %v1533_v7, %v1537_v45  ;;  %v1542_v22 = vor.u32 %v1541_v51, %v1537_v45  ;;  %v5113_v7 = vld [vmem:[#allocation50_spill] sm:$0xff]  ;;  %v1799_v45 = vunpack.c.l.b16 %v1507_v12  ;;  %v4349_v51 = vpack.c.b16 %v1835_v63, %v1834_v41 }
 0x22d   : > { %v4345_v28 = vpop.permute.xlu0 %1787  ;;  %v4363_v63 = vunpack.c.l.b16 %v1538_v24  ;;  %v4367_v38 = vpack.c.b16 %v1940_v43, %v1939_v42  ;;  %v5118_v24 = vld [vmem:[#allocation32_spill] sm:$0xff] }
 0x22e   : > { %1966 = vrot.lane.b32.xlu0 %v4015_v26, %s3021_s21  ;;  %5112 = vst [vmem:[#allocation40_spill] sm:$0xff] %v4345_v28  ;;  %v1543_v62 = vrot.slane %v1542_v22, 4  ;;  %v4357_v40 = vpack.c.b16 %v1800_v30, %v1799_v45  ;;  %v5124_v28 = vld [vmem:[#allocation6_spill] sm:$0xff] }
 0x22f   : > { %v4355_v48 = vpop.permute.xlu1 %1771 }
 0x230   : > { %5114 = vst [vmem:[#allocation5_spill] sm:$0xff] %v4355_v48  ;;  %v1548_v14 = vsel %vm3470_vm0, %v1543_v62, %v1547_v3 }
 0x231   : > { %v4365_v22 = vunpack.c.l.b16 %v1548_v14 }
 0x232   : > { %1845 = vrot.lane.b32.xlu1 %v5113_v7, %s3019_s18 }
 0x233   : > { %1915 = vrot.lane.b32.xlu2 %v4229_v60, %s3022_s22  ;;  %v4361_v25 = vpop.permute.xlu2 %1853 }
 0x235   : > { %v1743_v12 = vpop.permute.xlu0 %1742 }
 0x236   : > { %1837 = vrot.lane.b32.xlu0 %v5115_v36, %s3019_s18  ;;  %v5122_v36 = vld [vmem:[#allocation14_spill] sm:$0xff] }
 0x237   : > { %v4377_v0 = vpop.permute.xlu1 %1795 }
 0x238   : > { %5116 = vst [vmem:[#allocation29_spill] sm:$0xff] %v4377_v0 }
 0x23a   : > { %1907 = vrot.lane.b32.xlu1 %v4169_v55, %s3022_s22 }
 0x23b   : > { %1820 = vrot.lane.b32.xlu2 %v4244_v1, %s3020_s19  ;;  %v4379_v62 = vpop.permute.xlu2 %1752  ;;  %v5119_v1 = vld [vmem:[#allocation36_spill] sm:$0xff] }
 0x23c   : > { %5117 = vst [vmem:[#allocation24_spill] sm:$0xff] %v4379_v62  ;;  %v1556_v62 = vunpack.c.l.b16 %v5124_v28 }
 0x23d   : > { %v4383_v3 = vpop.permute.xlu0 %1861 }
 0x23e   : > { %1880 = vrot.lane.b32.xlu0 %v5118_v24, %s3017_s16 }
 0x23f   : > { %v1751_v57 = vpop.permute.xlu1 %1750 }
 0x242   : > { %1950 = vrot.lane.b32.xlu1 %v3994_v50, %s3021_s21 }
 0x243   : > { %1863 = vrot.lane.b32.xlu2 %v4015_v26, %s3019_s18  ;;  %v4389_v30 = vpop.permute.xlu2 %1668 }
 0x245   : > { %v1737_v41 = vpop.permute.xlu0 %1736 }
 0x246   : > { %1942 = vrot.lane.b32.xlu0 %v5119_v1, %s3021_s21 }
 0x248   : > { %v4397_v19 = vpop.permute.xlu1 %1744 }
 0x24a   : > { %1855 = vrot.lane.b32.xlu1 %v4041_v37, %s3019_s18  ;;  %v5121_v37 = vld [vmem:[#allocation26_spill] sm:$0xff] }
 0x24b   : > { %1925 = vrot.lane.b32.xlu2 %v4251_v13, %s3022_s22  ;;  %v4399_v45 = vpop.permute.xlu2 %1746  ;;  %v1557_v43 = vunpack.c.l.b16 %v5121_v37 }
 0x24d   : > { %v1761_v26 = vpop.permute.xlu0 %1760  ;;  %v1588_v37 = vpack.c.b16 %v1557_v43, %v1556_v62  ;;  %v5127_v62 = vld [vmem:[#allocation42_spill] sm:$0xff]  ;;  %v5128_v43 = vld [vmem:[#allocation48_spill] sm:$0xff] }
 0x24e   : > { %1828 = vrot.lane.b32.xlu0 %v4192_v27, %s3020_s19 }
 0x250   : > { %v1661_v42 = vpop.permute.xlu1 %1660 }
 0x251   : > { %v1989_v33 = vsel %vm1974_vm1, %v5122_v36, %v1661_v42 }
 0x252   : > { %1898 = vrot.lane.b32.xlu1 %v5120_v20, %s3017_s16  ;;  %v4414_v27 = vsel %vm2023_vm2, %v1989_v33, %v4263_v11 }
 0x253   : > { %1968 = vrot.lane.b32.xlu2 %v4087_v61, %s3021_s21  ;;  %v1663_v14 = vpop.permute.xlu2 %1662 }
 0x254   : > { %v1992_v48 = vsel %vm1974_vm1, %v5123_v2, %v1663_v14 }
 0x255   : > { %v4418_v0 = vsel %vm2023_vm2, %v1992_v48, %v1743_v12  ;;  %v1653_v7 = vpop.permute.xlu0 %1652 }
 0x256   : > { %1890 = vrot.lane.b32.xlu0 %v5125_v8, %s3017_s16  ;;  %v1977_v52 = vsel %vm1974_vm1, %v1588_v37, %v1653_v7 }
 0x257   : > { %v4427_v42 = vsel %vm2023_vm2, %v1977_v52, %v4300_v6  ;;  %v5126_v52 = vld [vmem:[#allocation49_spill] sm:$0xff] }
 0x258   : > { %v4431_v28 = vpop.permute.xlu1 %1738 }
 0x25a   : > { %1960 = vrot.lane.b32.xlu1 %v4091_v23, %s3021_s21 }
 0x25b   : > { %1839 = vrot.lane.b32.xlu2 %v5119_v1, %s3019_s18  ;;  %v1657_v11 = vpop.permute.xlu2 %1656 }
 0x25c   : > { %v1983_v48 = vsel %vm1974_vm1, %v5104_v16, %v1657_v11 }
 0x25d   : > { %v4436_v33 = vsel %vm2023_vm2, %v1983_v48, %v1737_v41  ;;  %v1677_v7 = vpop.permute.xlu0 %1676 }
 0x25e   : > { %1933 = vrot.lane.b32.xlu0 %v4285_v32, %s3022_s22 }
 0x260   : > { %v4444_v6 = vpop.permute.xlu1 %1762 }
 0x262   : > { %1812 = vrot.lane.b32.xlu1 %v4229_v60, %s3020_s19 }
 0x263   : > { %1882 = vrot.lane.b32.xlu2 %v5126_v52, %s3017_s16  ;;  %v1681_v12 = vpop.permute.xlu2 %1680 }
 0x264   : > { %v2019_v1 = vsel %vm1974_vm1, %v5127_v62, %v1681_v12  ;;  %v5129_v12 = vld [vmem:[#allocation27_spill] sm:$0xff] }
 0x265   : > { %v4449_v16 = vsel %vm2023_vm2, %v2019_v1, %v1761_v26  ;;  %v1755_v41 = vpop.permute.xlu0 %1754 }
 0x266   : > { %1804 = vrot.lane.b32.xlu0 %v4169_v55, %s3020_s19  ;;  %v2258_v55 = vld [vmem:[%s4884_s1 + $0x10] sm:$0x3] }
 0x267   : > { %v2268_v26 = vunpack.c.l.b16 %v2258_v55  ;;  %v5130_v55 = vld [vmem:[#allocation18_spill] sm:$0xff] }
 0x26a   : > { %1874 = vrot.lane.b32.xlu1 %v5128_v43, %s3017_s16  ;;  %v4457_v60 = vpop.permute.xlu1 %1654 }
 0x26b   : > { %1944 = vrot.lane.b32.xlu2 %v4044_v59, %s3021_s21 }
 0x26d   : > { %v1675_v14 = vpop.permute.xlu2 %1674 }
 0x26e   : > { %v2010_v37 = vsel %vm1974_vm1, %v5125_v8, %v1675_v14  ;;  %1847 = vrot.lane.b32.xlu0 %v3994_v50, %s3019_s18  ;;  %v2271_v8 = vpack.c.b16 %v2268_v26, %v2268_v26  ;;  %v2013_v26 = vsel %vm1974_vm1, %v5130_v55, %v1677_v7 }
 0x26f   : > { %v4462_v11 = vsel %vm2023_vm2, %v2010_v37, %v1755_v41  ;;  %v2812_v37 = vld [vmem:[%s4884_s1 + $0x8] sm:$0xff] }
 0x270   : > { %v1671_v48 = vpop.permute.xlu0 %1670  ;;  %v2309_v41 = vsel %vm2307_vm3, %v2271_v8, 0 }
 0x271   : > { %v2004_v62 = vsel %vm1974_vm1, %v5129_v12, %v1671_v48  ;;  %2909 = vmatpush.bf16.msra.mxu2 %v2309_v41  ;;  %2910 = vmatpush.bf16.msra.mxu3 %v2309_v41  ;;  %v2811_v48 = vld [vmem:[%s4884_s1] sm:$0xff] }
 0x272   : > { %1917 = vrot.lane.b32.xlu1 %v4271_v35, %s3022_s22  ;;  %v4474_v1 = vsel %vm2023_vm2, %v2004_v62, %v1751_v57  ;;  %v4478_v50 = vpop.permute.xlu1 %1678  ;;  %2908 = vmatpush.bf16.msra.mxu1 %v2309_v41 }
 0x273   : > { %1830 = vrot.lane.b32.xlu2 %v4285_v32, %s3020_s19  ;;  %2316 = vmatpush.bf16.msra.mxu0 %v2309_v41  ;;  %v2049_v32 = vsel %vm2023_vm2, %v2013_v26, %v4322_v5 }
 0x274   : > { %v2082_v5 = vsel %vm2056_vm4, %v2049_v32, %v4173_v44 }
 0x275   : > { %v4480_v14 = vpop.permute.xlu2 %1958  ;;  %2912 = vmatpush.bf16.msra.mxu2 %v2812_v37  ;;  %2913 = vmatpush.bf16.msra.mxu3 %v2812_v37 }
 0x276   : > { %1909 = vrot.lane.b32.xlu0 %v4265_v54, %s3022_s22  ;;  %2911 = vmatpush.bf16.msra.mxu1 %v2812_v37 }
 0x277   : > { %2317 = vmatpush.bf16.msra.mxu0 %v2812_v37 }
 0x278   : > { %v1819_v57 = vpop.permute.xlu0 %1818 }
 0x279   : > { %2915 = vmatpush.bf16.msra.mxu2 %v2811_v48  ;;  %2916 = vmatpush.bf16.msra.mxu3 %v2811_v48 }
 0x27a   : > { %1822 = vrot.lane.b32.xlu1 %v4251_v13, %s3020_s19  ;;  %v1827_v7 = vpop.permute.xlu1 %1826  ;;  %2914 = vmatpush.bf16.msra.mxu1 %v2811_v48 }
 0x27b   : > { %1892 = vrot.lane.b32.xlu2 %v5130_v55, %s3017_s16  ;;  %v2115_v8 = vsel %vm2089_vm5, %v2082_v5, %v1827_v7  ;;  %2318 = vmatpush.bf16.msra.mxu0 %v2811_v48  ;;  %v5132_v5 = vld [vmem:[#allocation22_spill] sm:$0xff] }
 0x27c   : > { %v2148_v13 = vsel %vm2122_vm6, %v2115_v8, %v4383_v3 }
 0x27d   : > { %v4500_v62 = vpop.permute.xlu2 %1810 }
 0x27e   : > { %1952 = vrot.lane.b32.xlu0 %v4085_v53, %s3021_s21 }
 0x280   : > { %v1665_v41 = vpop.permute.xlu0 %1664 }
 0x281   : > { %v1995_v37 = vsel %vm1974_vm1, %v5118_v24, %v1665_v41 }
 0x282   : > { %1865 = vrot.lane.b32.xlu1 %v4087_v61, %s3019_s18  ;;  %v4513_v44 = vsel %vm2023_vm2, %v1995_v37, %v4397_v19  ;;  %v5131_v19 = vld [vmem:[#allocation25_spill] sm:$0xff] }
 0x283   : > { %1935 = vrot.lane.b32.xlu2 %v4357_v40, %s3022_s22  ;;  %v2001_v32 = vsel %vm1974_vm1, %v5131_v19, %v4389_v30 }
 0x284   : > { %v4517_v3 = vpop.permute.xlu1 %1672 }
 0x285   : > { %v4519_v55 = vpop.permute.xlu2 %1872 }
 0x286   : > { %1857 = vrot.lane.b32.xlu0 %v4091_v23, %s3019_s18 }
 0x288   : > { %v1659_v26 = vpop.permute.xlu0 %1658 }
 0x289   : > { %v1986_v24 = vsel %vm1974_vm1, %v5128_v43, %v1659_v26 }
 0x28a   : > { %1927 = vrot.lane.b32.xlu1 %v3979_v18, %s3022_s22  ;;  %v4529_v61 = vsel %vm2023_vm2, %v1986_v24, %v4431_v28  ;;  %v2041_v28 = vsel %vm2023_vm2, %v2001_v32, %v4307_v34 }
 0x28b   : > { %1806 = vrot.lane.b32.xlu2 %v4265_v54, %s3020_s19  ;;  %v2074_v8 = vsel %vm2056_vm4, %v2041_v28, %v4235_v17 }
 0x28c   : > { %v1667_v48 = vpop.permute.xlu1 %1666 }
 0x28d   : > { %v1998_v23 = vsel %vm1974_vm1, %v5126_v52, %v1667_v48  ;;  %v1916_v7 = vpop.permute.xlu2 %1915  ;;  %v2107_v52 = vsel %vm2089_vm5, %v2074_v8, %v1819_v57 }
 0x28e   : > { %v4540_v43 = vsel %vm2023_vm2, %v1998_v23, %v4399_v45  ;;  %1900 = vrot.lane.b32.xlu0 %v5132_v5, %s3017_s16  ;;  %v2140_v17 = vsel %vm2122_vm6, %v2107_v52, %v4361_v25  ;;  %v5134_v25 = vld [vmem:[#allocation23_spill] sm:$0xff] }
 0x28f   : > { %v2173_v57 = vsel %vm2155_vm7, %v2140_v17, %v4281_v49  ;;  %v2181_v49 = vsel %vm2155_vm7, %v2148_v13, %v4237_v31  ;;  %v5136_v31 = vld [vmem:[#allocation46_spill] sm:$0xff] }
 0x290   : > { %v1683_v54 = vpop.permute.xlu0 %1682 }
 0x291   : > { %v2022_v30 = vsel %vm1974_vm1, %v5120_v20, %v1683_v54  ;;  %v5133_v20 = vld [vmem:[#allocation45_spill] sm:$0xff] }
 0x292   : > { %1970 = vrot.lane.b32.xlu1 %v4349_v51, %s3021_s21  ;;  %v4555_v45 = vsel %vm2023_vm2, %v2022_v30, %v4444_v6  ;;  %v2058_v30 = vsel %vm2056_vm4, %v4427_v42, %v4139_v46 }
 0x293   : > { %1849 = vrot.lane.b32.xlu2 %v4085_v53, %s3019_s18 }
 0x294   : > { %v1932_v34 = vpop.permute.xlu1 %1931 }
 0x295   : > { %v4559_v41 = vpop.permute.xlu2 %1820  ;;  %v2214_v32 = vsel %vm2188_vm9, %v2181_v49, %v1932_v34 }
 0x296   : > { %1962 = vrot.lane.b32.xlu0 %v5133_v20, %s3021_s21 }
 0x298   : > { %v1924_v6 = vpop.permute.xlu0 %1923 }
 0x299   : > { %v2206_v37 = vsel %vm2188_vm9, %v2173_v57, %v1924_v6 }
 0x29a   : > { %1841 = vrot.lane.b32.xlu1 %v4044_v59, %s3019_s18  ;;  %v2239_v53 = vsel %vm2221_vm8, %v2206_v37, %v4480_v14  ;;  %v5135_v14 = vld [vmem:[#allocation44_spill] sm:$0xff] }
 0x29b   : > { %1911 = vrot.lane.b32.xlu2 %v5134_v25, %s3022_s22  ;;  %2799 = vmatmul.msk.bf16.vlgmr.msra.gmra.mxu2 %vm2274_vm10, %v2239_v53 }
 0x29c   : > { %v1803_v26 = vpop.permute.xlu1 %1802 }
 0x29d   : > { %v4575_v24 = vpop.permute.xlu2 %1863 }
 0x29e   : > { %1814 = vrot.lane.b32.xlu0 %v4271_v35, %s3020_s19 }
 0x2a0   : > { %v1967_v59 = vpop.permute.xlu0 %1966 }
 0x2a1   : > { %v2247_v48 = vsel %vm2221_vm8, %v2214_v32, %v1967_v59 }
 0x2a2   : > { %1884 = vrot.lane.b32.xlu1 %v5131_v19, %s3017_s16  ;;  %2803 = vmatmul.msk.bf16.vlgmr.msra.gmra.mxu3 %vm2274_vm10, %v2247_v48  ;;  %v2066_v19 = vsel %vm2056_vm4, %v4414_v27, %v4249_v10  ;;  %v2091_v10 = vsel %vm2089_vm5, %v2058_v30, %v1803_v26  ;;  %v2076_v26 = vsel %vm2056_vm4, %v4474_v1, %v4204_v39 }
 0x2a3   : > { %1954 = vrot.lane.b32.xlu2 %v5135_v14, %s3021_s21  ;;  %v2099_v5 = vsel %vm2089_vm5, %v2066_v19, %v4500_v62  ;;  %v5141_v19 = vld [vmem:[#allocation31_spill] sm:$0xff] }
 0x2a4   : > { %v1846_v23 = vpop.permute.xlu1 %1845 }
 0x2a5   : > { %v1926_v35 = vpop.permute.xlu2 %1925 }
 0x2a6   : > { %1876 = vrot.lane.b32.xlu0 %v5122_v36, %s3017_s16  ;;  %v2132_v36 = vsel %vm2122_vm6, %v2099_v5, %v1846_v23 }
 0x2a8   : > { %v1838_v28 = vpop.permute.xlu0 %1837 }
 0x2a9   : > { %v2124_v34 = vsel %vm2122_vm6, %v2091_v10, %v1838_v28  ;;  %v5140_v28 = vld [vmem:[#allocation28_spill] sm:$0xff] }
 0x2aa   : > { %1946 = vrot.lane.b32.xlu1 %v5136_v31, %s3021_s21  ;;  %v2157_v46 = vsel %vm2155_vm7, %v2124_v34, %v4519_v55  ;;  %v5139_v55 = vpack.c.b16 %v4365_v22, %v4363_v63 }
 0x2ab   : > { %1859 = vrot.lane.b32.xlu2 %v5133_v20, %s3019_s18  ;;  %v5137_v20 = vld [vmem:[#allocation34_spill] sm:$0xff] }
 0x2ac   : > { %v1908_v13 = vpop.permute.xlu1 %1907  ;;  %v2016_v53 = vsel %vm1974_vm1, %v5137_v20, %v4478_v50 }
 0x2ad   : > { %v1969_v52 = vpop.permute.xlu2 %1968  ;;  %v2051_v63 = vsel %vm2023_vm2, %v2016_v53, %v4326_v47 }
 0x2ae   : > { %1919 = vrot.lane.b32.xlu0 %v3953_v58, %s3022_s22 }
 0x2b0   : > { %v1881_v54 = vpop.permute.xlu0 %1880 }
 0x2b1   : > { %v2165_v8 = vsel %vm2155_vm7, %v2132_v36, %v1881_v54 }
 0x2b2   : > { %1832 = vrot.lane.b32.xlu1 %v4357_v40, %s3020_s19  ;;  %v2198_v62 = vsel %vm2188_vm9, %v2165_v8, %v1916_v7  ;;  %v2190_v40 = vsel %vm2188_vm9, %v2157_v46, %v1908_v13  ;;  %v5138_v7 = vld [vmem:[#allocation20_spill] sm:$0xff]  ;;  %v5143_v8 = vld [vmem:[#allocation50_spill] sm:$0xff] }
 0x2b3   : > { %1902 = vrot.lane.b32.xlu2 %v4320_v29, %s3017_s16 }
 0x2b4   : > { %v1951_v27 = vpop.permute.xlu1 %1950 }
 0x2b5   : > { %v2231_v17 = vsel %vm2221_vm8, %v2198_v62, %v1951_v27  ;;  %v1840_v6 = vpop.permute.xlu2 %1839 }
 0x2b6   : > { %2795 = vmatmul.msk.bf16.vlgmr.msra.gmra.mxu1 %vm2274_vm10, %v2231_v17  ;;  %1824 = vrot.lane.b32.xlu0 %v3979_v18, %s3020_s19 }
 0x2b8   : > { %v1943_v29 = vpop.permute.xlu0 %1942 }
 0x2b9   : > { %v2223_v42 = vsel %vm2221_vm8, %v2190_v40, %v1943_v29 }
 0x2ba   : > { %1894 = vrot.lane.b32.xlu1 %v5137_v20, %s3017_s16  ;;  %2791 = vmatmul.msk.bf16.vlgmr.msra.gmra.mxu0 %vm2274_vm10, %v2223_v42 }
 0x2bb   : > { %1964 = vrot.lane.b32.xlu2 %v5138_v7, %s3021_s21 }
 0x2bc   : > { %v1856_v57 = vpop.permute.xlu1 %1855 }
 0x2bd   : > { %v1883_v49 = vpop.permute.xlu2 %1882 }
 0x2be   : > { %1867 = vrot.lane.b32.xlu0 %v4349_v51, %s3019_s18  ;;  %v2109_v51 = vsel %vm2089_vm5, %v2076_v26, %v4559_v41  ;;  %v5147_v26 = vld [vmem:[#allocation24_spill] sm:$0xff] }
 0x2c0   : > { %v1829_v18 = vpop.permute.xlu0 %1828 }
 0x2c2   : > { %1937 = vrot.lane.b32.xlu1 %v5139_v55, %s3022_s22 }
 0x2c3   : > { %1816 = vrot.lane.b32.xlu2 %v3953_v58, %s3020_s19  ;;  %v2142_v58 = vsel %vm2122_vm6, %v2109_v51, %v1856_v57 }
 0x2c4   : > { %v1899_v37 = vpop.permute.xlu1 %1898 }
 0x2c6   : > { %1929 = vrot.lane.b32.xlu0 %v4171_v56, %s3022_s22  ;;  %v2084_v56 = vsel %vm2056_vm4, %v2051_v63, %v4291_v4 }
 0x2c7   : > { %v2117_v50 = vsel %vm2089_vm5, %v2084_v56, %v1829_v18  ;;  %v5145_v18 = vld [vmem:[#allocation39_spill] sm:$0xff] }
 0x2c8   : > { %v1891_v22 = vpop.permute.xlu0 %1890  ;;  %v2150_v41 = vsel %vm2122_vm6, %v2117_v50, %v4575_v24  ;;  %v2007_v55 = vsel %vm1974_vm1, %v5145_v18, %v4517_v3 }
 0x2c9   : > { %v2175_v32 = vsel %vm2155_vm7, %v2142_v58, %v1891_v22 }
 0x2ca   : > { %1808 = vrot.lane.b32.xlu1 %v5134_v25, %s3020_s19  ;;  %v2208_v1 = vsel %vm2188_vm9, %v2175_v32, %v1926_v35  ;;  %v1945_v25 = vpop.permute.xlu2 %1944  ;;  %v5148_v32 = vld [vmem:[#allocation40_spill] sm:$0xff] }
 0x2cb   : > { %1878 = vrot.lane.b32.xlu2 %v5123_v2, %s3017_s16  ;;  %v2183_v2 = vsel %vm2155_vm7, %v2150_v41, %v1899_v37  ;;  %v5146_v37 = vld [vmem:[#allocation29_spill] sm:$0xff] }
 0x2cc   : > { %v1961_v39 = vpop.permute.xlu1 %1960  ;;  %v2086_v53 = vsel %vm2056_vm4, %v4449_v16, %v5146_v37 }
 0x2cd   : > { %v2241_v47 = vsel %vm2221_vm8, %v2208_v1, %v1961_v39 }
 0x2ce   : > { %2800 = vmatmul.msk.bf16.gmra.mxu2 %vm2274_vm10, %v2241_v47  ;;  %1972 = vrot.lane.b32.xlu0 %v4367_v38, %s3021_s21 }
 0x2d0   : > { %v1934_v59 = vpop.permute.xlu0 %1933 }
 0x2d1   : > { %v2216_v4 = vsel %vm2188_vm9, %v2183_v2, %v1934_v59 }
 0x2d2   : > { %1851 = vrot.lane.b32.xlu1 %v5135_v14, %s3019_s18  ;;  %v2249_v48 = vsel %vm2221_vm8, %v2216_v4, %v1969_v52  ;;  %v1831_v23 = vpop.permute.xlu2 %1830  ;;  %v1980_v14 = vsel %vm1974_vm1, %v5140_v28, %v4457_v60  ;;  %v5144_v52 = vld [vmem:[#allocation21_spill] sm:$0xff] }
 0x2d3   : > { %1921 = vrot.lane.b32.xlu2 %v4167_v9, %s3022_s22  ;;  %2804 = vmatmul.msk.bf16.gmra.mxu3 %vm2274_vm10, %v2249_v48  ;;  %v2027_v9 = vsel %vm2023_vm2, %v1980_v14, %v4303_v21  ;;  %v2068_v10 = vsel %vm2056_vm4, %v4418_v0, %v5144_v52  ;;  %v2119_v51 = vsel %vm2089_vm5, %v2086_v53, %v1831_v23  ;;  %v5149_v23 = vld [vmem:[#allocation5_spill] sm:$0xff] }
 0x2d4   : > { %v1813_v38 = vpop.permute.xlu1 %1812 }
 0x2d5   : > { %v2101_v62 = vsel %vm2089_vm5, %v2068_v10, %v1813_v38  ;;  %v4748_v10 = vld [vmem:[%s4885_s2 + $0x1] ss:$0 sm:$0xff] }
 0x2d6   : > { %1843 = vrot.lane.b32.xlu0 %v5136_v31, %s3019_s18  ;;  %v5142_v31 = vld [vmem:[#allocation38_spill] sm:$0xff] }
 0x2d7   : > { %v2060_v5 = vsel %vm2056_vm4, %v2027_v9, %v5142_v31  ;;  %v5150_v31 = vld [vmem:[#allocation19_spill] sm:$0xff] }
 0x2d8   : > { %v1805_v24 = vpop.permute.xlu0 %1804 }
 0x2d9   : > { %v2093_v54 = vsel %vm2089_vm5, %v2060_v5, %v1805_v24  ;;  %v2070_v5 = vsel %vm2056_vm4, %v4513_v44, %v5150_v31 }
 0x2da   : > { %1913 = vrot.lane.b32.xlu1 %v4037_v15, %s3022_s22  ;;  %v1893_v36 = vpop.permute.xlu2 %1892  ;;  %v2126_v60 = vsel %vm2122_vm6, %v2093_v54, %v1840_v6 }
 0x2dc   : > { %v1875_v35 = vpop.permute.xlu1 %1874 }
 0x2de   : > { %1886 = vrot.lane.b32.xlu0 %v5129_v12, %s3017_s16  ;;  %v2159_v12 = vsel %vm2155_vm7, %v2126_v60, %v1875_v35  ;;  %v2062_v35 = vsel %vm2056_vm4, %v4436_v33, %v5149_v23  ;;  %v4739_v33 = vld [vmem:[%s4885_s2] ss:$0 sm:$0xff]  ;;  %v5152_v23 = vld [vmem:[#allocation7_spill] sm:$0xff] }
 0x2e0   : > { %v1848_v13 = vpop.permute.xlu0 %1847 }
 0x2e1   : > { %v2134_v17 = vsel %vm2122_vm6, %v2101_v62, %v1848_v13 }
 0x2e2   : > { %1956 = vrot.lane.b32.xlu1 %v5141_v19, %s3021_s21  ;;  %v1936_v46 = vpop.permute.xlu2 %1935  ;;  %v2167_v40 = vsel %vm2155_vm7, %v2134_v17, %v1883_v49  ;;  %v2045_v49 = vsel %vm2023_vm2, %v2007_v55, %v5147_v26 }
 0x2e3   : > { %v2078_v56 = vsel %vm2056_vm4, %v2045_v49, %v5148_v32 }
 0x2e4   : > { %v1918_v15 = vpop.permute.xlu1 %1917 }
 0x2e5   : > { %v2200_v29 = vsel %vm2188_vm9, %v2167_v40, %v1918_v15 }
 0x2e6   : > { %1948 = vrot.lane.b32.xlu0 %v5143_v8, %s3021_s21 }
 0x2e8   : > { %v1910_v30 = vpop.permute.xlu0 %1909 }
 0x2e9   : > { %v2192_v21 = vsel %vm2188_vm9, %v2159_v12, %v1910_v30 }
 0x2ea   : > { %v2225_v27 = vsel %vm2221_vm8, %v2192_v21, %v1945_v25  ;;  %v1807_v7 = vpop.permute.xlu2 %1806 }
 0x2eb   : > { %2792 = vmatmul.msk.bf16.gmra.mxu0 %vm2274_vm10, %v2225_v27  ;;  %v2095_v14 = vsel %vm2089_vm5, %v2062_v35, %v1807_v7  ;;  %v2088_v35 = vsel %vm2056_vm4, %v4555_v45, %v5152_v23 }
 0x2ec   : > { %v1823_v34 = vpop.permute.xlu1 %1822 }
 0x2ed   : > { %v2111_v3 = vsel %vm2089_vm5, %v2078_v56, %v1823_v34 }
 0x2f0   : > { %v1953_v42 = vpop.permute.xlu0 %1952 }
 0x2f1   : > { %v2233_v20 = vsel %vm2221_vm8, %v2200_v29, %v1953_v42 }
 0x2f2   : > { %2796 = vmatmul.msk.bf16.gmra.mxu1 %vm2274_vm10, %v2233_v20  ;;  %v1850_v39 = vpop.permute.xlu2 %1849 }
 0x2f4   : > { %v1866_v0 = vpop.permute.xlu1 %1865 }
 0x2f5   : > { %v2152_v63 = vsel %vm2122_vm6, %v2119_v51, %v1866_v0 }
 0x2f8   : > { %v1858_v57 = vpop.permute.xlu0 %1857 }
 0x2f9   : > { %v2144_v16 = vsel %vm2122_vm6, %v2111_v3, %v1858_v57 }
 0x2fa   : > { %v2177_v41 = vsel %vm2155_vm7, %v2144_v16, %v1893_v36  ;;  %v1912_v48 = vpop.permute.xlu2 %1911 }
 0x2fc   : > { %v1928_v6 = vpop.permute.xlu1 %1927 }
 0x2fd   : > { %v2210_v2 = vsel %vm2188_vm9, %v2177_v41, %v1928_v6 }
 0x300   : > { %v1901_v58 = vpop.permute.xlu0 %1900 }
 0x301   : > { %v2185_v22 = vsel %vm2155_vm7, %v2152_v63, %v1901_v58 }
 0x302   : > { %v2218_v50 = vsel %vm2188_vm9, %v2185_v22, %v1936_v46  ;;  %v1955_v28 = vpop.permute.xlu2 %1954 }
 0x304   : > { %v1971_v1 = vpop.permute.xlu1 %1970 }
 0x305   : > { %v2251_v47 = vsel %vm2221_vm8, %v2218_v50, %v1971_v1 }
 0x306   : > { %2805 = vmatmul.msk.bf16.gmra.mxu3 %vm2274_vm10, %v2251_v47 }
 0x308   : > { %v1963_v25 = vpop.permute.xlu0 %1962 }
 0x309   : > { %v2243_v59 = vsel %vm2221_vm8, %v2210_v2, %v1963_v25 }
 0x30a   : > { %2801 = vmatmul.msk.bf16.gmra.mxu2 %vm2274_vm10, %v2243_v59  ;;  %v1860_v30 = vpop.permute.xlu2 %1859 }
 0x30c   : > { %v1842_v4 = vpop.permute.xlu1 %1841 }
 0x30d   : > { %v2128_v9 = vsel %vm2122_vm6, %v2095_v14, %v1842_v4 }
 0x310   : > { %v1815_v38 = vpop.permute.xlu0 %1814 }
 0x311   : > { %v2103_v54 = vsel %vm2089_vm5, %v2070_v5, %v1815_v38 }
 0x312   : > { %v2136_v12 = vsel %vm2122_vm6, %v2103_v54, %v1850_v39  ;;  %v1903_v57 = vpop.permute.xlu2 %1902  ;;  %v5151_v39 = vld [vmem:[#allocation8_spill] sm:$0xff] }
 0x313   : > { %v2080_v3 = vsel %vm2056_vm4, %v4462_v11, %v5151_v39 }
 0x314   : > { %v1885_v24 = vpop.permute.xlu1 %1884 }
 0x315   : > { %v2169_v44 = vsel %vm2155_vm7, %v2136_v12, %v1885_v24 }
 0x318   : > { %v1877_v13 = vpop.permute.xlu0 %1876 }
 0x319   : > { %v2161_v19 = vsel %vm2155_vm7, %v2128_v9, %v1877_v13 }
 0x31a   : > { %v2194_v36 = vsel %vm2188_vm9, %v2161_v19, %v1912_v48  ;;  %v1965_v50 = vpop.permute.xlu2 %1964 }
 0x31c   : > { %v1947_v15 = vpop.permute.xlu1 %1946 }
 0x31d   : > { %v2227_v8 = vsel %vm2221_vm8, %v2194_v36, %v1947_v15 }
 0x31e   : > { %2793 = vmatmul.msk.bf16.gmra.mxu0 %vm2274_vm10, %v2227_v8  ;;  %v2360_v60 = vpop.f32.mrf.mxu2 }
 0x31f   : > { %v2418_v52 = vmul.f32 %v4739_v33, %v2360_v60 }
 0x320   : > { %v1920_v21 = vpop.permute.xlu0 %1919 }
 0x321   : > { %v2202_v27 = vsel %vm2188_vm9, %v2169_v44, %v1920_v21  ;;  %v2452_v17 = vadd.f32 %v4748_v10, %v2418_v52 }
 0x322   : > { %v2235_v62 = vsel %vm2221_vm8, %v2202_v27, %v1955_v28  ;;  %v1817_v54 = vpop.permute.xlu2 %1816 }
 0x323   : > { %2797 = vmatmul.msk.bf16.gmra.mxu1 %vm2274_vm10, %v2235_v62  ;;  %v2516_v0 = vmul.f32 0.1, %v2452_v17  ;;  %vm2484_vm11 = vcmp.gt.f32.partialorder %v2452_v17, 0.0 }
 0x324   : > { %v1833_v34 = vpop.permute.xlu1 %1832 }
 0x325   : > { %v2380_v46 = vpop.f32.mrf.mxu3  ;;  %v2548_v37 = vsel %vm2484_vm11, %v2452_v17, %v2516_v0  ;;  %v2121_v13 = vsel %vm2089_vm5, %v2088_v35, %v1833_v34 }
 0x326   : > { %v2362_v40 = vpop.f32.mrf.mxu2  ;;  %v2426_v42 = vmul.f32 %v4739_v33, %v2380_v46 }
 0x327   : > { %v2419_v29 = vmul.f32 %v4739_v33, %v2362_v40 }
 0x328   : > { %v1825_v20 = vpop.permute.xlu0 %1824  ;;  %v2460_v55 = vadd.f32 %v4748_v10, %v2426_v42 }
 0x329   : > { %v2453_v7 = vadd.f32 %v4748_v10, %v2419_v29  ;;  %v2113_v47 = vsel %vm2089_vm5, %v2080_v3, %v1825_v20 }
 0x32a   : > { %v2524_v63 = vmul.f32 0.1, %v2460_v55  ;;  %vm2492_vm13 = vcmp.gt.f32.partialorder %v2460_v55, 0.0  ;;  %v2146_v59 = vsel %vm2122_vm6, %v2113_v47, %v1860_v30 }
 0x32b   : > { %vm2485_vm12 = vcmp.gt.f32.partialorder %v2453_v7, 0.0  ;;  %v2517_v6 = vmul.f32 0.1, %v2453_v7 }
 0x32c   : > { %v1895_v18 = vpop.permute.xlu1 %1894  ;;  %v2556_v16 = vsel %vm2492_vm13, %v2460_v55, %v2524_v63 }
 0x32d   : > { %v2549_v53 = vsel %vm2485_vm12, %v2453_v7, %v2517_v6  ;;  %v2382_v26 = vpop.f32.mrf.mxu3  ;;  %v2179_v48 = vsel %vm2155_vm7, %v2146_v59, %v1895_v18  ;;  %v1879_v7 = vpop.permute.xlu2 %1878  ;;  %v5153_v18 = vld [vmem:[#allocation37_spill] sm:$0xff] }
 0x32e   : > { %v2856_v49 = vpack.c.bf16 %v2549_v53, %v2548_v37  ;;  %v2427_v51 = vmul.f32 %v4739_v33, %v2382_v26  ;;  %v2072_v55 = vsel %vm2056_vm4, %v4540_v43, %v5153_v18 }
 0x32f   : > { %v2105_v37 = vsel %vm2089_vm5, %v2072_v55, %v1817_v54 }
 0x330   : > { %2900 = vst [vmem:[%s4762_s8 + $0x40] sm:$0xff] %v2856_v49   ;;  %v2461_v58 = vadd.f32 %v4748_v10, %v2427_v51  ;;  %v1868_v22 = vpop.permute.xlu0 %1867 }
 0x331   : > { %v2154_v5 = vsel %vm2122_vm6, %v2121_v13, %v1868_v22 }
 0x332   : > { %vm2493_vm14 = vcmp.gt.f32.partialorder %v2461_v58, 0.0  ;;  %v2525_v32 = vmul.f32 0.1, %v2461_v58  ;;  %v2187_v8 = vsel %vm2155_vm7, %v2154_v5, %v1903_v57 }
 0x333   : > { %v2340_v56 = vpop.f32.mrf.mxu1 }
 0x334   : > { %v1938_v1 = vpop.permute.xlu1 %1937  ;;  %v2557_v41 = vsel %vm2493_vm14, %v2461_v58, %v2525_v32  ;;  %v2410_v25 = vmul.f32 %v4739_v33, %v2340_v56  ;;  %v5154_v58 = vld [vmem:[#allocation33_spill] sm:$0xff] }
 0x335   : > { %v2876_v2 = vpack.c.bf16 %v2557_v41, %v2556_v16  ;;  %v2220_v30 = vsel %vm2188_vm9, %v2187_v8, %v1938_v1  ;;  %v1922_v63 = vpop.permute.xlu2 %1921  ;;  %v2064_v22 = vsel %vm2056_vm4, %v4529_v61, %v5154_v58 }
 0x336   : > { %v2444_v24 = vadd.f32 %v4748_v10, %v2410_v25 }
 0x337   : > { %2904 = vst [vmem:[%s4762_s8 + $0x60] sm:$0xff] %v2876_v2   ;;  %v2320_v4 = vpop.f32.mrf.mxu0 }
 0x338   : > { %v1930_v38 = vpop.permute.xlu0 %1929  ;;  %v2402_v28 = vmul.f32 %v4739_v33, %v2320_v4  ;;  %v2508_v15 = vmul.f32 0.1, %v2444_v24  ;;  %vm2476_vm15 = vcmp.gt.f32.partialorder %v2444_v24, 0.0 }
 0x339   : > { %v2212_v11 = vsel %vm2188_vm9, %v2179_v48, %v1930_v38 }
 0x33a   : > { %v2245_v14 = vsel %vm2221_vm8, %v2212_v11, %v1965_v50  ;;  %v2436_v45 = vadd.f32 %v4748_v10, %v2402_v28  ;;  %v2540_v52 = vsel %vm2476_vm15, %v2444_v24, %v2508_v15 }
 0x33b   : > { %v2342_v9 = vpop.f32.mrf.mxu1  ;;  %2802 = vmatmul.msk.bf16.gmra.mxu2 %vm2274_vm10, %v2245_v14 }
 0x33c   : > { %v2411_v19 = vmul.f32 %v4739_v33, %v2342_v9  ;;  %v1809_v31 = vpop.permute.xlu1 %1808  ;;  %v2500_v34 = vmul.f32 0.1, %v2436_v45  ;;  %vm2468_vm1 = vcmp.gt.f32.partialorder %v2436_v45, 0.0 }
 0x33d   : > { %v2097_v32 = vsel %vm2089_vm5, %v2064_v22, %v1809_v31 }
 0x33e   : > { %v2445_v36 = vadd.f32 %v4748_v10, %v2411_v19  ;;  %v2532_v42 = vsel %vm2468_vm1, %v2436_v45, %v2500_v34 }
 0x33f   : > { %v2322_v12 = vpop.f32.mrf.mxu0 }
 0x340   : > { %vm2477_vm0 = vcmp.gt.f32.partialorder %v2445_v36, 0.0  ;;  %v2509_v60 = vmul.f32 0.1, %v2445_v36  ;;  %v2403_v44 = vmul.f32 %v4739_v33, %v2322_v12  ;;  %v1973_v21 = vpop.permute.xlu0 %1972 }
 0x341   : > { %v2253_v62 = vsel %vm2221_vm8, %v2220_v30, %v1973_v21 }
 0x342   : > { %v2541_v27 = vsel %vm2477_vm0, %v2445_v36, %v2509_v60  ;;  %v2437_v46 = vadd.f32 %v4748_v10, %v2403_v44  ;;  %2806 = vmatmul.msk.bf16.gmra.mxu3 %vm2274_vm10, %v2253_v62 }
 0x343   : > { %v2836_v17 = vpack.c.bf16 %v2541_v27, %v2540_v52 }
 0x344   : > { %v1852_v40 = vpop.permute.xlu1 %1851  ;;  %vm2469_vm2 = vcmp.gt.f32.partialorder %v2437_v46, 0.0  ;;  %v2501_v29 = vmul.f32 0.1, %v2437_v46 }
 0x345   : > { %2896 = vst [vmem:[%s4762_s8 + $0x20] sm:$0xff] %v2836_v17   ;;  %v2138_v53 = vsel %vm2122_vm6, %v2105_v37, %v1852_v40 }
 0x346   : > { %v2533_v20 = vsel %vm2469_vm2, %v2437_v46, %v2501_v29 }
 0x347   : > { %v2816_v0 = vpack.c.bf16 %v2533_v20, %v2532_v42 }
 0x348   : > { %v1844_v57 = vpop.permute.xlu0 %1843 }
 0x349   : > { %2817 = vst [vmem:[%s4762_s8] sm:$0xff] %v2816_v0   ;;  %v2130_v3 = vsel %vm2122_vm6, %v2097_v32, %v1844_v57 }
 0x34a   : > { %v2163_v16 = vsel %vm2155_vm7, %v2130_v3, %v1879_v7 }
 0x34c   : > { %v1914_v6 = vpop.permute.xlu1 %1913 }
 0x34d   : > { %v2196_v61 = vsel %vm2188_vm9, %v2163_v16, %v1914_v6 }
 0x350   : > { %v1887_v26 = vpop.permute.xlu0 %1886 }
 0x351   : > { %v2365_v49 = vpop.f32.mrf.mxu2  ;;  %v2171_v51 = vsel %vm2155_vm7, %v2138_v53, %v1887_v26 }
 0x352   : > { %v2420_v56 = vmul.f32 %v4739_v33, %v2365_v49  ;;  %v2204_v43 = vsel %vm2188_vm9, %v2171_v51, %v1922_v63 }
 0x354   : > { %v1957_v39 = vpop.permute.xlu1 %1956  ;;  %v2454_v47 = vadd.f32 %v4748_v10, %v2420_v56 }
 0x355   : > { %v2237_v1 = vsel %vm2221_vm8, %v2204_v43, %v1957_v39 }
 0x356   : > { %2798 = vmatmul.msk.bf16.gmra.mxu1 %vm2274_vm10, %v2237_v1  ;;  %v2385_v50 = vpop.f32.mrf.mxu3  ;;  %v2518_v48 = vmul.f32 0.1, %v2454_v47  ;;  %vm2486_vm3 = vcmp.gt.f32.partialorder %v2454_v47, 0.0 }
 0x357   : > { %v2428_v25 = vmul.f32 %v4739_v33, %v2385_v50 }
 0x358   : > { %v1949_v41 = vpop.permute.xlu0 %1948  ;;  %v2550_v35 = vsel %vm2486_vm3, %v2454_v47, %v2518_v48 }
 0x359   : > { %v2367_v2 = vpop.f32.mrf.mxu2  ;;  %v2229_v59 = vsel %vm2221_vm8, %v2196_v61, %v1949_v41  ;;  %v2462_v24 = vadd.f32 %v4748_v10, %v2428_v25 }
 0x35a   : > { %v2421_v4 = vmul.f32 %v4739_v33, %v2367_v2  ;;  %2794 = vmatmul.msk.bf16.gmra.mxu0 %vm2274_vm10, %v2229_v59 }
 0x35b   : > { %v2526_v13 = vmul.f32 0.1, %v2462_v24  ;;  %vm2494_vm5 = vcmp.gt.f32.partialorder %v2462_v24, 0.0 }
 0x35c   : > { %v2455_v38 = vadd.f32 %v4748_v10, %v2421_v4 }
 0x35d   : > { %v2558_v5 = vsel %vm2494_vm5, %v2462_v24, %v2526_v13 }
 0x35e   : > { %vm2487_vm4 = vcmp.gt.f32.partialorder %v2455_v38, 0.0  ;;  %v2519_v11 = vmul.f32 0.1, %v2455_v38  ;;  %v2387_v23 = vpop.f32.mrf.mxu3 }
 0x35f   : > { %v2429_v14 = vmul.f32 %v4739_v33, %v2387_v23 }
 0x360   : > { %v2551_v28 = vsel %vm2487_vm4, %v2455_v38, %v2519_v11 }
 0x361   : > { %v2861_v9 = vpack.c.bf16 %v2551_v28, %v2550_v35  ;;  %v2463_v19 = vadd.f32 %v4748_v10, %v2429_v14 }
 0x363   : > { %2901 = vst [vmem:[%s4762_s8 + $0x48] sm:$0xff] %v2861_v9   ;;  %vm2495_vm6 = vcmp.gt.f32.partialorder %v2463_v19, 0.0  ;;  %v2527_v31 = vmul.f32 0.1, %v2463_v19 }
 0x365   : > { %v2559_v15 = vsel %vm2495_vm6, %v2463_v19, %v2527_v31 }
 0x366   : > { %v2881_v36 = vpack.c.bf16 %v2559_v15, %v2558_v5 }
 0x368   : > { %2905 = vst [vmem:[%s4762_s8 + $0x68] sm:$0xff] %v2881_v36   ;;  %v2325_v54 = vpop.f32.mrf.mxu0 }
 0x369   : > { %v2404_v45 = vmul.f32 %v4739_v33, %v2325_v54 }
 0x36b   : > { %v2438_v8 = vadd.f32 %v4748_v10, %v2404_v45 }
 0x36d   : > { %v2502_v21 = vmul.f32 0.1, %v2438_v8  ;;  %vm2470_vm7 = vcmp.gt.f32.partialorder %v2438_v8, 0.0 }
 0x36f   : > { %v2345_v60 = vpop.f32.mrf.mxu1  ;;  %v2534_v34 = vsel %vm2470_vm7, %v2438_v8, %v2502_v21 }
 0x370   : > { %v2327_v12 = vpop.f32.mrf.mxu0  ;;  %v2412_v44 = vmul.f32 %v4739_v33, %v2345_v60 }
 0x371   : > { %v2405_v30 = vmul.f32 %v4739_v33, %v2327_v12 }
 0x372   : > { %v2446_v62 = vadd.f32 %v4748_v10, %v2412_v44 }
 0x373   : > { %v2439_v52 = vadd.f32 %v4748_v10, %v2405_v30 }
 0x374   : > { %v2510_v42 = vmul.f32 0.1, %v2446_v62  ;;  %vm2478_vm9 = vcmp.gt.f32.partialorder %v2446_v62, 0.0 }
 0x375   : > { %vm2471_vm8 = vcmp.gt.f32.partialorder %v2439_v52, 0.0  ;;  %v2503_v27 = vmul.f32 0.1, %v2439_v52 }
 0x376   : > { %v2542_v7 = vsel %vm2478_vm9, %v2446_v62, %v2510_v42 }
 0x377   : > { %v2535_v17 = vsel %vm2471_vm8, %v2439_v52, %v2503_v27  ;;  %v2347_v46 = vpop.f32.mrf.mxu1 }
 0x378   : > { %v2821_v40 = vpack.c.bf16 %v2535_v17, %v2534_v34  ;;  %v2413_v29 = vmul.f32 %v4739_v33, %v2347_v46 }
 0x37a   : > { %2893 = vst [vmem:[%s4762_s8 + $0x8] sm:$0xff] %v2821_v40   ;;  %v2447_v20 = vadd.f32 %v4748_v10, %v2413_v29 }
 0x37c   : > { %vm2479_vm10 = vcmp.gt.f32.partialorder %v2447_v20, 0.0  ;;  %v2511_v0 = vmul.f32 0.1, %v2447_v20 }
 0x37e   : > { %v2543_v57 = vsel %vm2479_vm10, %v2447_v20, %v2511_v0 }
 0x37f   : > { %v2841_v6 = vpack.c.bf16 %v2543_v57, %v2542_v7 }
 0x381   : > { %2897 = vst [vmem:[%s4762_s8 + $0x28] sm:$0xff] %v2841_v6  }
 0x389   : > { %v2390_v18 = vpop.f32.mrf.mxu3 }
 0x38a   : > { %v2430_v55 = vmul.f32 %v4739_v33, %v2390_v18 }
 0x38c   : > { %v2464_v53 = vadd.f32 %v4748_v10, %v2430_v55 }
 0x38d   : > { %v2370_v37 = vpop.f32.mrf.mxu2 }
 0x38e   : > { %v2422_v26 = vmul.f32 %v4739_v33, %v2370_v37  ;;  %v2528_v63 = vmul.f32 0.1, %v2464_v53  ;;  %vm2496_vm11 = vcmp.gt.f32.partialorder %v2464_v53, 0.0 }
 0x390   : > { %v2456_v22 = vadd.f32 %v4748_v10, %v2422_v26  ;;  %v2560_v43 = vsel %vm2496_vm11, %v2464_v53, %v2528_v63 }
 0x391   : > { %v2392_v49 = vpop.f32.mrf.mxu3 }
 0x392   : > { %v2431_v51 = vmul.f32 %v4739_v33, %v2392_v49  ;;  %v2520_v1 = vmul.f32 0.1, %v2456_v22  ;;  %vm2488_vm13 = vcmp.gt.f32.partialorder %v2456_v22, 0.0 }
 0x394   : > { %v2465_v58 = vadd.f32 %v4748_v10, %v2431_v51  ;;  %v2552_v41 = vsel %vm2488_vm13, %v2456_v22, %v2520_v1 }
 0x395   : > { %v2372_v56 = vpop.f32.mrf.mxu2 }
 0x396   : > { %vm2497_vm12 = vcmp.gt.f32.partialorder %v2465_v58, 0.0  ;;  %v2529_v32 = vmul.f32 0.1, %v2465_v58  ;;  %v2423_v39 = vmul.f32 %v4739_v33, %v2372_v56 }
 0x398   : > { %v2561_v3 = vsel %vm2497_vm12, %v2465_v58, %v2529_v32  ;;  %v2457_v16 = vadd.f32 %v4748_v10, %v2423_v39 }
 0x399   : > { %v2886_v50 = vpack.c.bf16 %v2561_v3, %v2560_v43 }
 0x39a   : > { %vm2489_vm14 = vcmp.gt.f32.partialorder %v2457_v16, 0.0  ;;  %v2521_v47 = vmul.f32 0.1, %v2457_v16 }
 0x39b   : > { %2906 = vst [vmem:[%s4762_s8 + $0x70] sm:$0xff] %v2886_v50   ;;  %v2330_v61 = vpop.f32.mrf.mxu0 }
 0x39c   : > { %v2553_v2 = vsel %vm2489_vm14, %v2457_v16, %v2521_v47  ;;  %v2406_v59 = vmul.f32 %v4739_v33, %v2330_v61 }
 0x39d   : > { %v2866_v25 = vpack.c.bf16 %v2553_v2, %v2552_v41 }
 0x39e   : > { %v2440_v48 = vadd.f32 %v4748_v10, %v2406_v59 }
 0x39f   : > { %2902 = vst [vmem:[%s4762_s8 + $0x50] sm:$0xff] %v2866_v25  }
 0x3a0   : > { %v2350_v4 = vpop.f32.mrf.mxu1  ;;  %v2504_v23 = vmul.f32 0.1, %v2440_v48  ;;  %vm2472_vm15 = vcmp.gt.f32.partialorder %v2440_v48, 0.0 }
 0x3a1   : > { %v2414_v24 = vmul.f32 %v4739_v33, %v2350_v4 }
 0x3a2   : > { %v2536_v13 = vsel %vm2472_vm15, %v2440_v48, %v2504_v23 }
 0x3a3   : > { %v2332_v38 = vpop.f32.mrf.mxu0  ;;  %v2448_v28 = vadd.f32 %v4748_v10, %v2414_v24 }
 0x3a4   : > { %v2407_v11 = vmul.f32 %v4739_v33, %v2332_v38 }
 0x3a5   : > { %v2512_v15 = vmul.f32 0.1, %v2448_v28  ;;  %vm2480_vm1 = vcmp.gt.f32.partialorder %v2448_v28, 0.0 }
 0x3a6   : > { %v2441_v35 = vadd.f32 %v4748_v10, %v2407_v11 }
 0x3a7   : > { %v2544_v45 = vsel %vm2480_vm1, %v2448_v28, %v2512_v15 }
 0x3a8   : > { %vm2473_vm0 = vcmp.gt.f32.partialorder %v2441_v35, 0.0  ;;  %v2505_v14 = vmul.f32 0.1, %v2441_v35  ;;  %v2352_v9 = vpop.f32.mrf.mxu1 }
 0x3a9   : > { %v2415_v31 = vmul.f32 %v4739_v33, %v2352_v9 }
 0x3aa   : > { %v2537_v19 = vsel %vm2473_vm0, %v2441_v35, %v2505_v14 }
 0x3ab   : > { %v2826_v5 = vpack.c.bf16 %v2537_v19, %v2536_v13  ;;  %v2449_v36 = vadd.f32 %v4748_v10, %v2415_v31 }
 0x3ad   : > { %2894 = vst [vmem:[%s4762_s8 + $0x10] sm:$0xff] %v2826_v5   ;;  %vm2481_vm2 = vcmp.gt.f32.partialorder %v2449_v36, 0.0  ;;  %v2513_v54 = vmul.f32 0.1, %v2449_v36 }
 0x3af   : > { %v2545_v8 = vsel %vm2481_vm2, %v2449_v36, %v2513_v54 }
 0x3b0   : > { %v2846_v60 = vpack.c.bf16 %v2545_v8, %v2544_v45 }
 0x3b2   : > { %2898 = vst [vmem:[%s4762_s8 + $0x30] sm:$0xff] %v2846_v60  }
 0x3be   : > { %v2375_v12 = vpop.f32.mrf.mxu2 }
 0x3bf   : > { %v2424_v30 = vmul.f32 %v4739_v33, %v2375_v12 }
 0x3c1   : > { %v2458_v44 = vadd.f32 %v4748_v10, %v2424_v30 }
 0x3c3   : > { %v2522_v34 = vmul.f32 0.1, %v2458_v44  ;;  %vm2490_vm3 = vcmp.gt.f32.partialorder %v2458_v44, 0.0 }
 0x3c5   : > { %v2395_v21 = vpop.f32.mrf.mxu3  ;;  %v2554_v29 = vsel %vm2490_vm3, %v2458_v44, %v2522_v34 }
 0x3c6   : > { %v2377_v52 = vpop.f32.mrf.mxu2  ;;  %v2432_v62 = vmul.f32 %v4739_v33, %v2395_v21 }
 0x3c7   : > { %v2425_v27 = vmul.f32 %v4739_v33, %v2377_v52 }
 0x3c8   : > { %v2466_v40 = vadd.f32 %v4748_v10, %v2432_v62 }
 0x3c9   : > { %v2459_v17 = vadd.f32 %v4748_v10, %v2425_v27 }
 0x3ca   : > { %v2530_v57 = vmul.f32 0.1, %v2466_v40  ;;  %vm2498_vm5 = vcmp.gt.f32.partialorder %v2466_v40, 0.0 }
 0x3cb   : > { %vm2491_vm4 = vcmp.gt.f32.partialorder %v2459_v17, 0.0  ;;  %v2523_v46 = vmul.f32 0.1, %v2459_v17 }
 0x3cc   : > { %v2562_v37 = vsel %vm2498_vm5, %v2466_v40, %v2530_v57 }
 0x3cd   : > { %v2555_v42 = vsel %vm2491_vm4, %v2459_v17, %v2523_v46  ;;  %v2397_v20 = vpop.f32.mrf.mxu3 }
 0x3ce   : > { %v2871_v0 = vpack.c.bf16 %v2555_v42, %v2554_v29  ;;  %v2433_v7 = vmul.f32 %v4739_v33, %v2397_v20 }
 0x3d0   : > { %2903 = vst [vmem:[%s4762_s8 + $0x58] sm:$0xff] %v2871_v0   ;;  %v2467_v6 = vadd.f32 %v4748_v10, %v2433_v7 }
 0x3d2   : > { %vm2499_vm6 = vcmp.gt.f32.partialorder %v2467_v6, 0.0  ;;  %v2531_v18 = vmul.f32 0.1, %v2467_v6 }
 0x3d3   : > { %v2355_v55 = vpop.f32.mrf.mxu1 }
 0x3d4   : > { %v2563_v53 = vsel %vm2499_vm6, %v2467_v6, %v2531_v18  ;;  %v2416_v49 = vmul.f32 %v4739_v33, %v2355_v55 }
 0x3d5   : > { %v2891_v26 = vpack.c.bf16 %v2563_v53, %v2562_v37 }
 0x3d6   : > { %v2450_v63 = vadd.f32 %v4748_v10, %v2416_v49 }
 0x3d7   : > { %2907 = vst [vmem:[%s4762_s8 + $0x78] sm:$0xff] %v2891_v26   ;;  %v2335_v51 = vpop.f32.mrf.mxu0 }
 0x3d8   : > { %v2408_v58 = vmul.f32 %v4739_v33, %v2335_v51  ;;  %v2514_v56 = vmul.f32 0.1, %v2450_v63  ;;  %vm2482_vm7 = vcmp.gt.f32.partialorder %v2450_v63, 0.0 }
 0x3da   : > { %v2442_v43 = vadd.f32 %v4748_v10, %v2408_v58  ;;  %v2546_v16 = vsel %vm2482_vm7, %v2450_v63, %v2514_v56 }
 0x3db   : > { %v2357_v22 = vpop.f32.mrf.mxu1 }
 0x3dc   : > { %v2417_v32 = vmul.f32 %v4739_v33, %v2357_v22  ;;  %v2506_v61 = vmul.f32 0.1, %v2442_v43  ;;  %vm2474_vm9 = vcmp.gt.f32.partialorder %v2442_v43, 0.0 }
 0x3de   : > { %v2451_v39 = vadd.f32 %v4748_v10, %v2417_v32  ;;  %v2538_v59 = vsel %vm2474_vm9, %v2442_v43, %v2506_v61 }
 0x3df   : > { %v2337_v1 = vpop.f32.mrf.mxu0 }
 0x3e0   : > { %vm2483_vm8 = vcmp.gt.f32.partialorder %v2451_v39, 0.0  ;;  %v2515_v3 = vmul.f32 0.1, %v2451_v39  ;;  %v2409_v50 = vmul.f32 %v4739_v33, %v2337_v1 }
 0x3e2   : > { %v2547_v47 = vsel %vm2483_vm8, %v2451_v39, %v2515_v3  ;;  %v2443_v2 = vadd.f32 %v4748_v10, %v2409_v50 }
 0x3e3   : > { %v2851_v41 = vpack.c.bf16 %v2547_v47, %v2546_v16 }
 0x3e4   : > { %vm2475_vm10 = vcmp.gt.f32.partialorder %v2443_v2, 0.0  ;;  %v2507_v25 = vmul.f32 0.1, %v2443_v2 }
 0x3e5   : > { %2899 = vst [vmem:[%s4762_s8 + $0x38] sm:$0xff] %v2851_v41  }
 0x3e6   : > { %v2539_v4 = vsel %vm2475_vm10, %v2443_v2, %v2507_v25 }
 0x3e7   : > { %v2831_v48 = vpack.c.bf16 %v2539_v4, %v2538_v59 }
 0x3e9   : > { %2895 = vst [vmem:[%s4762_s8 + $0x18] sm:$0xff] %v2831_v48  }
 0x3ea PF: > { %s13_s14 = sadd.s32 1, %s2993_s14   ;;  %s5155_s12 = smov %s2989_s13 }
 0x3eb   : > { %p10_p5 = scmp.ge.s32.totalorder %s13_s14, 4   ;;  %s5156_s13 = smov %s5158_s15 }
 0x3ed   :  { %12 = sbr.rel (!%p10_p5) target bundleno = 2 (0x2), region = 73 }

</bundles_post_ra>
